<compile_context>
chip_gen: v7x
topology: tpu7x:2x2x1
jax: 0.10.0
libtpu: 0.0.40
codegen_flags: <defaults>
</compile_context>

<pallas_src>
import math

import numpy as np
import jax
import jax.numpy as jnp
from jax.experimental import pallas as pl
from jax.experimental.pallas import tpu as pltpu

_MIB = 1024 * 1024
_SQRT1_2 = 0.7071067811865476


# ----------------------------------------------------------------------------
# Exact GELU (erf-based, matches PyTorch nn.GELU default) from Mosaic-safe ops
# ----------------------------------------------------------------------------
def _erf_f32(x):
    # Abramowitz & Stegun 7.1.26, max abs error ~1.5e-7.  Pure VPU + one EUP exp.
    a1, a2, a3, a4, a5 = (0.254829592, -0.284496736, 1.421413741,
                          -1.453152027, 1.061405429)
    p = 0.3275911
    s = jnp.where(x >= 0.0, 1.0, -1.0).astype(jnp.float32)
    ax = jnp.abs(x)
    # exact divide kept on purpose: an approx reciprocal (~1e-3 rel err) would
    # dominate the erf-polynomial accuracy budget.
    t = 1.0 / (1.0 + p * ax)
    poly = ((((a5 * t + a4) * t + a3) * t + a2) * t + a1) * t
    return s * (1.0 - poly * jnp.exp(-ax * ax))


def _gelu_exact_f32(x):
    return 0.5 * x * (1.0 + _erf_f32(x * _SQRT1_2))


# ----------------------------------------------------------------------------
# Kernel 1: resident-weight path (W1/W2 stay in VMEM for the whole grid)
# ----------------------------------------------------------------------------
def _mlp_kernel_resident(x_ref, w1_ref, b1_ref, w2_ref, b2_ref, o_ref):
    # x_ref: (tm, in_f)   w1_ref: (in_f, hid)  b1_ref: (1, hid)
    # w2_ref: (hid, out_f) b2_ref: (1, out_f)  o_ref : (tm, out_f)
    x = x_ref[...].astype(w1_ref.dtype)        # bf16 weights -> bf16 MXU operands
    h = jnp.dot(x, w1_ref[...], preferred_element_type=jnp.float32)
    h = h + b1_ref[...].astype(jnp.float32)
    h = _gelu_exact_f32(h)                     # dropout(p=0) == identity
    h = h.astype(w2_ref.dtype)
    y = jnp.dot(h, w2_ref[...], preferred_element_type=jnp.float32)
    y = y + b2_ref[...].astype(jnp.float32)
    o_ref[...] = y.astype(o_ref.dtype)


# ----------------------------------------------------------------------------
# Kernel 2: hidden-dim-tiled path (weights streamed, fc2 accumulated in VMEM).
# Used when W1+W2 exceed the VMEM budget (e.g. wide MLPs on v7x's 64 MiB).
# ----------------------------------------------------------------------------
def _mlp_kernel_hidden_tiled(x_ref, w1_ref, b1_ref, w2_ref, b2_ref, o_ref,
                             acc_ref):
    # grid = (row blocks ["parallel"], hidden blocks ["arbitrary", innermost])
    j = pl.program_id(1)

    @pl.when(j == 0)
    def _():
        acc_ref[...] = jnp.zeros_like(acc_ref)

    x = x_ref[...].astype(w1_ref.dtype)
    h = jnp.dot(x, w1_ref[...], preferred_element_type=jnp.float32)
    h = h + b1_ref[...].astype(jnp.float32)
    h = _gelu_exact_f32(h)
    h = h.astype(w2_ref.dtype)
    acc_ref[...] += jnp.dot(h, w2_ref[...], preferred_element_type=jnp.float32)

    @pl.when(j == pl.num_programs(1) - 1)
    def _():
        o_ref[...] = (acc_ref[...]
                      + b2_ref[...].astype(jnp.float32)).astype(o_ref.dtype)


# ----------------------------------------------------------------------------
# Helpers
# ----------------------------------------------------------------------------
def _vmem_capacity_bytes():
    try:
        return int(pltpu.get_tpu_info().vmem_capacity_bytes)
    except Exception:
        return 64 * _MIB                 # v7x has the smallest VMEM; be safe


def _invariant_spec(shape, index_map, single_buffer):
    """BlockSpec for a grid-invariant operand; single-buffered when supported."""
    if single_buffer:
        try:
            return pl.BlockSpec(shape, index_map, pipeline_mode=pl.Buffered(1))
        except Exception:                # older jax: no pipeline_mode/Buffered
            pass
    return pl.BlockSpec(shape, index_map)


def _round_up(a, b):
    return -(-a // b) * b


# ----------------------------------------------------------------------------
# Wrapper
# ----------------------------------------------------------------------------
def mlp_forward(x, w1, b1, w2, b2, *, drop=0.0, tm=None, hidden_block=None,
                mxu_dtype=None):
    """JAX/Pallas equivalent of MLP.forward.

    Weights are pre-transposed relative to torch.nn.Linear:
      w1: (in_features, hidden_features), w2: (hidden_features, out_features).

    mxu_dtype: optionally cast the weight matrices (and hence both MXU
      operands) to e.g. jnp.bfloat16 — recommended on v6e/v7x (about 2x MXU
      throughput, half the weight VMEM/HBM traffic).  Accumulation stays f32.
    """
    assert drop == 0.0  # TODO(synk): training-mode dropout (p>0) not implemented.

    orig_shape = x.shape
    in_f = int(orig_shape[-1])
    hid, out_f = int(w1.shape[1]), int(w2.shape[1])
    assert w1.shape[0] == in_f and w2.shape[0] == hid
    # NOTE: in_f/hid/out_f should be multiples of 128 (out_f matters most:
    # otherwise output stores become masked vst.msk and the MXU N dim is
    # underfilled).  Non-multiples still compile, just slower.

    if mxu_dtype is not None:
        w1 = w1.astype(mxu_dtype)
        w2 = w2.astype(mxu_dtype)

    M = int(np.prod(orig_shape[:-1]))
    x2 = x.reshape(M, in_f)
    b1_2d = b1.reshape(1, hid)
    b2_2d = b2.reshape(1, out_f)

    x_b = jnp.dtype(x.dtype).itemsize
    w_b = jnp.dtype(w1.dtype).itemsize
    o_b = x_b                                     # output dtype == input dtype
    sub = {4: 8, 2: 16, 1: 32}.get(x_b, 8)        # dtype-aware sublane packing

    vmem_cap = _vmem_capacity_bytes()
    budget = int(vmem_cap * 0.75)                 # headroom for compiler scratch

    # ------------------------- row tile (tm) -------------------------------
    # Default 256 fills the 256x256 MXU M dim on v6e/v7x and amortizes the
    # ~0.35us/step grid overhead; bounded by VMEM (hidden intermediate grows
    # linearly with tm) and shrunk to keep >=2 row blocks for the two v7x TCs.
    tm = 256 if tm is None else int(tm)
    tm = _round_up(max(1, min(tm, M)), sub)
    if M > sub:
        tm = min(tm, _round_up(-(-M // 2), sub))

    weight_bytes = (in_f * hid + hid * out_f + hid + out_f) * w_b
    h_elem_bytes = 4 + (w_b if w_b < 4 else 0)    # f32 h (+ narrow copy for fc2)

    def dyn_bytes(tm_, k_):                       # per-row-tile working set
        return (2 * tm_ * (in_f * x_b + out_f * o_b)   # double-buffered x / out
                + tm_ * out_f * 4                      # f32 result / accumulator
                + tm_ * k_ * h_elem_bytes)             # hidden intermediate

    while tm > sub and dyn_bytes(tm, hid) > budget // 2:
        tm = max(sub, _round_up(tm // 2, sub))

    # -------------------- resident vs. hidden-tiled -------------------------
    use_tiled = hidden_block is not None
    if not use_tiled and weight_bytes + dyn_bytes(tm, hid) > budget:
        use_tiled = (hid % 128 == 0)              # tiling needs 128-mult blocks

    th, n_hid = hid, 1
    if use_tiled:
        if hidden_block is not None:
            th = int(hidden_block)
        else:
            th = 128
            for cand in range(hid, 127, -128):    # largest divisor that fits
                if hid % cand:
                    continue
                stream = 2 * (in_f * cand + cand * out_f + cand) * w_b
                if stream + out_f * w_b + dyn_bytes(tm, cand) <= budget:
                    th = cand
                    break
        assert hid % th == 0, "hidden_block must divide hidden_features"
        assert th == hid or th % 128 == 0, "hidden_block must be a multiple of 128"
        n_hid = hid // th

    n_rows = -(-M // tm)

    # ------------------- VMEM limit & cost estimate -------------------------
    if use_tiled:
        need = (2 * (in_f * th + th * out_f + th) * w_b + out_f * w_b
                + dyn_bytes(tm, th))
    else:
        # count weights twice in case single-buffering is not honoured
        need = 2 * weight_bytes + dyn_bytes(tm, hid)
    vmem_limit = int(min(vmem_cap, max(32 * _MIB, int(need * 1.25) + 2 * _MIB)))

    weight_passes = n_rows if use_tiled else 1
    cost = pl.CostEstimate(
        flops=2 * M * hid * (in_f + out_f),
        transcendentals=M * hid,                  # one exp per hidden element
        bytes_accessed=int(M * in_f * x_b + M * out_f * o_b
                           + weight_passes * weight_bytes))

    # ---------------------------- build & run -------------------------------
    def run(single_buffer_weights):
        if use_tiled:
            in_specs = [
                pl.BlockSpec((tm, in_f), lambda i, j: (i, 0)),      # x (held over j)
                pl.BlockSpec((in_f, th), lambda i, j: (0, j)),      # W1 col block
                pl.BlockSpec((1, th), lambda i, j: (0, j)),         # b1 block
                pl.BlockSpec((th, out_f), lambda i, j: (j, 0)),     # W2 row block
                _invariant_spec((1, out_f), lambda i, j: (0, 0),
                                single_buffer_weights),             # b2
            ]
            out_specs = pl.BlockSpec((tm, out_f), lambda i, j: (i, 0))
            grid = (n_rows, n_hid)
            kernel = _mlp_kernel_hidden_tiled
            scratch = [pltpu.VMEM((tm, out_f), jnp.float32)]
            dims = ("parallel", "arbitrary")
        else:
            in_specs = [
                pl.BlockSpec((tm, in_f), lambda i: (i, 0)),         # x row tile
                _invariant_spec((in_f, hid), lambda i: (0, 0),
                                single_buffer_weights),             # W1 resident
                _invariant_spec((1, hid), lambda i: (0, 0),
                                single_buffer_weights),             # b1
                _invariant_spec((hid, out_f), lambda i: (0, 0),
                                single_buffer_weights),             # W2 resident
                _invariant_spec((1, out_f), lambda i: (0, 0),
                                single_buffer_weights),             # b2
            ]
            out_specs = pl.BlockSpec((tm, out_f), lambda i: (i, 0))
            grid = (n_rows,)
            kernel = _mlp_kernel_resident
            scratch = []
            dims = ("parallel",)

        return pl.pallas_call(
            kernel,
            out_shape=jax.ShapeDtypeStruct((M, out_f), x.dtype),
            grid=grid,
            in_specs=in_specs,
            out_specs=out_specs,
            scratch_shapes=scratch,
            cost_estimate=cost,
            compiler_params=pltpu.CompilerParams(
                dimension_semantics=dims,
                vmem_limit_bytes=vmem_limit),
        )(x2, w1, b1_2d, w2, b2_2d)

    try:
        out = run(single_buffer_weights=True)
    except Exception:
        # pipeline_mode=pl.Buffered(1) unsupported on this jax version:
        # fall back to default (double-buffered) specs for invariant operands.
        out = run(single_buffer_weights=False)

    return out.reshape(*orig_shape[:-1], out_f)


# ----------------------------------------------------------------------------
# Pure-JAX reference (mirrors the PyTorch module: exact GELU, dropout p=0)
# ----------------------------------------------------------------------------
def reference_mlp(x, w1, b1, w2, b2):
    h = jnp.dot(x, w1) + b1
    h = jax.nn.gelu(h, approximate=False)     # PyTorch nn.GELU default (erf)
    return jnp.dot(h, w2) + b2


# ----------------------------------------------------------------------------
if __name__ == "__main__":
    # Small, lane-dense ViT/DINO-style MLP block.
    batch, seq = 2, 8
    in_features, hidden_features, out_features = 128, 256, 128

    key = jax.random.PRNGKey(0)
    kx, k1, kb1, k2, kb2 = jax.random.split(key, 5)

    x = jax.random.normal(kx, (batch, seq, in_features), jnp.float32)
    w1 = jax.random.normal(k1, (in_features, hidden_features), jnp.float32)
    w1 = w1 / math.sqrt(in_features)
    b1 = 0.1 * jax.random.normal(kb1, (hidden_features,), jnp.float32)
    w2 = jax.random.normal(k2, (hidden_features, out_features), jnp.float32)
    w2 = w2 / math.sqrt(hidden_features)
    b2 = 0.1 * jax.random.normal(kb2, (out_features,), jnp.float32)

    y_ref = np.asarray(reference_mlp(x, w1, b1, w2, b2))

    # 1) resident-weight kernel, multi-tile "parallel" row grid (tm=8 -> 2 blocks)
    y = jax.block_until_ready(mlp_forward(x, w1, b1, w2, b2, tm=8))
    assert y.shape == (batch, seq, out_features), y.shape
    err = float(np.max(np.abs(np.asarray(y) - y_ref)))
    assert np.allclose(np.asarray(y), y_ref, rtol=1e-4, atol=1e-4), err

    # 2) hidden-dim-tiled kernel (v7x / large-width VMEM fallback), forced here
    y_t = jax.block_until_ready(
        mlp_forward(x, w1, b1, w2, b2, tm=8, hidden_block=128))
    err_t = float(np.max(np.abs(np.asarray(y_t) - y_ref)))
    assert np.allclose(np.asarray(y_t), y_ref, rtol=1e-4, atol=1e-4), err_t

    # 3) bf16 MXU operands (recommended on v6e/v7x), f32 accumulation, looser tol
    y_b = jax.block_until_ready(
        mlp_forward(x.astype(jnp.bfloat16), w1, b1, w2, b2,
                    mxu_dtype=jnp.bfloat16))
    y_b32 = np.asarray(y_b.astype(jnp.float32))
    err_b = float(np.max(np.abs(y_b32 - y_ref)))
    assert np.allclose(y_b32, y_ref, rtol=5e-2, atol=5e-2), err_b

    print("KERNEL_OK")
</pallas_src>

<mosaic_0001>
module attributes {stable_mosaic.version = 11 : i64} {
  func.func @_mlp_kernel_resident(%arg0: i32, %arg1: memref<8x128xf32, #tpu.memory_space<vmem>>, %arg2: memref<128x256xf32, #tpu.memory_space<vmem>>, %arg3: memref<1x256xf32, #tpu.memory_space<vmem>>, %arg4: memref<256x128xf32, #tpu.memory_space<vmem>>, %arg5: memref<1x128xf32, #tpu.memory_space<vmem>>, %arg6: memref<8x128xf32, #tpu.memory_space<vmem>>) attributes {dimension_semantics = [#tpu.dimension_semantics<parallel>], iteration_bounds = array<i64: 2>, scalar_prefetch = 0 : i64, scratch_operands = 0 : i64, tpu.core_type = #tpu.core_type<tc>, window_params = [{transform_indices = @transform_0, window_bounds = array<i64: 8, 128>}, {pipeline_mode = #tpu.pipeline_mode<synchronous>, transform_indices = @transform_1, window_bounds = array<i64: 128, 256>}, {pipeline_mode = #tpu.pipeline_mode<synchronous>, transform_indices = @transform_2, window_bounds = array<i64: 1, 256>}, {pipeline_mode = #tpu.pipeline_mode<synchronous>, transform_indices = @transform_3, window_bounds = array<i64: 256, 128>}, {pipeline_mode = #tpu.pipeline_mode<synchronous>, transform_indices = @transform_4, window_bounds = array<i64: 1, 128>}, {transform_indices = @transform_5, window_bounds = array<i64: 8, 128>}]} {
    %c0 = arith.constant 0 : index
    %c0_0 = arith.constant 0 : index
    %0 = vector.load %arg1[%c0, %c0_0] : memref<8x128xf32, #tpu.memory_space<vmem>>, vector<8x128xf32>
    %c0_1 = arith.constant 0 : index
    %c0_2 = arith.constant 0 : index
    %1 = vector.load %arg2[%c0_1, %c0_2] : memref<128x256xf32, #tpu.memory_space<vmem>>, vector<128x256xf32>
    %cst = arith.constant dense<0.000000e+00> : vector<8x256xf32>
    %2 = tpu.matmul %0, %1, %cst {dimension_numbers = #tpu.dot_dimension_numbers<[1], [0], [0], [1], [0, 0, 1, 1], [], []>} : vector<8x128xf32>, vector<128x256xf32>, vector<8x256xf32> -> vector<8x256xf32>
    %c0_3 = arith.constant 0 : index
    %c0_4 = arith.constant 0 : index
    %3 = vector.load %arg3[%c0_3, %c0_4] : memref<1x256xf32, #tpu.memory_space<vmem>>, vector<1x256xf32>
    %4 = vector.broadcast %3 : vector<1x256xf32> to vector<8x256xf32>
    %5 = arith.addf %2, %4 : vector<8x256xf32>
    %cst_5 = arith.constant 5.000000e-01 : f32
    %6 = vector.broadcast %cst_5 : f32 to vector<8x256xf32>
    %7 = arith.mulf %6, %5 : vector<8x256xf32>
    %cst_6 = arith.constant 0.707106769 : f32
    %8 = vector.broadcast %cst_6 : f32 to vector<8x256xf32>
    %9 = arith.mulf %5, %8 : vector<8x256xf32>
    %cst_7 = arith.constant 0.000000e+00 : f32
    %10 = vector.broadcast %cst_7 : f32 to vector<8x256xf32>
    %11 = arith.cmpf oge, %9, %10 : vector<8x256xf32>
    %cst_8 = arith.constant 1.000000e+00 : f32
    %cst_9 = arith.constant -1.000000e+00 : f32
    %12 = vector.broadcast %cst_8 : f32 to vector<8x256xf32>
    %13 = vector.broadcast %cst_9 : f32 to vector<8x256xf32>
    %14 = arith.select %11, %12, %13 : vector<8x256xi1>, vector<8x256xf32>
    %15 = math.absf %9 : vector<8x256xf32>
    %cst_10 = arith.constant 0.327591091 : f32
    %16 = vector.broadcast %cst_10 : f32 to vector<8x256xf32>
    %17 = arith.mulf %16, %15 : vector<8x256xf32>
    %cst_11 = arith.constant 1.000000e+00 : f32
    %18 = vector.broadcast %cst_11 : f32 to vector<8x256xf32>
    %19 = arith.addf %18, %17 : vector<8x256xf32>
    %cst_12 = arith.constant 1.000000e+00 : f32
    %20 = vector.broadcast %cst_12 : f32 to vector<8x256xf32>
    %21 = arith.divf %20, %19 : vector<8x256xf32>
    %cst_13 = arith.constant 1.06140542 : f32
    %22 = vector.broadcast %cst_13 : f32 to vector<8x256xf32>
    %23 = arith.mulf %22, %21 : vector<8x256xf32>
    %cst_14 = arith.constant -1.45315206 : f32
    %24 = vector.broadcast %cst_14 : f32 to vector<8x256xf32>
    %25 = arith.addf %23, %24 : vector<8x256xf32>
    %26 = arith.mulf %25, %21 : vector<8x256xf32>
    %cst_15 = arith.constant 1.42141378 : f32
    %27 = vector.broadcast %cst_15 : f32 to vector<8x256xf32>
    %28 = arith.addf %26, %27 : vector<8x256xf32>
    %29 = arith.mulf %28, %21 : vector<8x256xf32>
    %cst_16 = arith.constant -0.284496725 : f32
    %30 = vector.broadcast %cst_16 : f32 to vector<8x256xf32>
    %31 = arith.addf %29, %30 : vector<8x256xf32>
    %32 = arith.mulf %31, %21 : vector<8x256xf32>
    %cst_17 = arith.constant 0.254829586 : f32
    %33 = vector.broadcast %cst_17 : f32 to vector<8x256xf32>
    %34 = arith.addf %32, %33 : vector<8x256xf32>
    %35 = arith.mulf %34, %21 : vector<8x256xf32>
    %cst_18 = arith.constant 0.000000e+00 : f32
    %36 = vector.broadcast %cst_18 : f32 to vector<8x256xf32>
    %37 = arith.subf %36, %15 : vector<8x256xf32>
    %38 = arith.mulf %37, %15 : vector<8x256xf32>
    %39 = math.exp %38 : vector<8x256xf32>
    %40 = arith.mulf %35, %39 : vector<8x256xf32>
    %cst_19 = arith.constant 1.000000e+00 : f32
    %41 = vector.broadcast %cst_19 : f32 to vector<8x256xf32>
    %42 = arith.subf %41, %40 : vector<8x256xf32>
    %43 = arith.mulf %14, %42 : vector<8x256xf32>
    %cst_20 = arith.constant 1.000000e+00 : f32
    %44 = vector.broadcast %cst_20 : f32 to vector<8x256xf32>
    %45 = arith.addf %44, %43 : vector<8x256xf32>
    %46 = arith.mulf %7, %45 : vector<8x256xf32>
    %c0_21 = arith.constant 0 : index
    %c0_22 = arith.constant 0 : index
    %47 = vector.load %arg4[%c0_21, %c0_22] : memref<256x128xf32, #tpu.memory_space<vmem>>, vector<256x128xf32>
    %cst_23 = arith.constant dense<0.000000e+00> : vector<8x128xf32>
    %48 = tpu.matmul %46, %47, %cst_23 {dimension_numbers = #tpu.dot_dimension_numbers<[1], [0], [0], [1], [0, 0, 1, 1], [], []>} : vector<8x256xf32>, vector<256x128xf32>, vector<8x128xf32> -> vector<8x128xf32>
    %c0_24 = arith.constant 0 : index
    %c0_25 = arith.constant 0 : index
    %49 = vector.load %arg5[%c0_24, %c0_25] : memref<1x128xf32, #tpu.memory_space<vmem>>, vector<1x128xf32>
    %50 = vector.broadcast %49 : vector<1x128xf32> to vector<8x128xf32>
    %51 = arith.addf %48, %50 : vector<8x128xf32>
    %c0_26 = arith.constant 0 : index
    %c0_27 = arith.constant 0 : index
    %52 = vector.load %arg6[%c0_26, %c0_27] : memref<8x128xf32, #tpu.memory_space<vmem>>, vector<8x128xf32>
    tpu.vector_store %arg6[%c0_26, %c0_27], %51 {strides = array<i32>} : memref<8x128xf32, #tpu.memory_space<vmem>>, vector<8x128xf32>,
    return
  }
  func.func @transform_0(%arg0: i32) -> (i32, i32) {
    %c0_i32 = arith.constant 0 : i32
    %c0_i32_0 = arith.constant 0 : i32
    return %arg0, %c0_i32 : i32, i32
  }
  func.func @transform_1(%arg0: i32) -> (i32, i32) {
    %c0_i32 = arith.constant 0 : i32
    %c0_i32_0 = arith.constant 0 : i32
    %c0_i32_1 = arith.constant 0 : i32
    return %c0_i32, %c0_i32_0 : i32, i32
  }
  func.func @transform_2(%arg0: i32) -> (i32, i32) {
    %c0_i32 = arith.constant 0 : i32
    %c0_i32_0 = arith.constant 0 : i32
    %c0_i32_1 = arith.constant 0 : i32
    return %c0_i32, %c0_i32_0 : i32, i32
  }
  func.func @transform_3(%arg0: i32) -> (i32, i32) {
    %c0_i32 = arith.constant 0 : i32
    %c0_i32_0 = arith.constant 0 : i32
    %c0_i32_1 = arith.constant 0 : i32
    return %c0_i32, %c0_i32_0 : i32, i32
  }
  func.func @transform_4(%arg0: i32) -> (i32, i32) {
    %c0_i32 = arith.constant 0 : i32
    %c0_i32_0 = arith.constant 0 : i32
    %c0_i32_1 = arith.constant 0 : i32
    return %c0_i32, %c0_i32_0 : i32, i32
  }
  func.func @transform_5(%arg0: i32) -> (i32, i32) {
    %c0_i32 = arith.constant 0 : i32
    %c0_i32_0 = arith.constant 0 : i32
    return %arg0, %c0_i32 : i32, i32
  }
}

module attributes {stable_mosaic.version = 11 : i64} {
  func.func @_mlp_kernel_resident(%arg0: i32, %arg1: memref<8x128xf32, #tpu.memory_space<vmem>>, %arg2: memref<128x256xf32, #tpu.memory_space<vmem>>, %arg3: memref<1x256xf32, #tpu.memory_space<vmem>>, %arg4: memref<256x128xf32, #tpu.memory_space<vmem>>, %arg5: memref<1x128xf32, #tpu.memory_space<vmem>>, %arg6: memref<8x128xf32, #tpu.memory_space<vmem>>) attributes {dimension_semantics = [#tpu.dimension_semantics<parallel>], iteration_bounds = array<i64: 2>, scalar_prefetch = 0 : i64, scratch_operands = 0 : i64, tpu.core_type = #tpu.core_type<tc>, window_params = [{transform_indices = @transform_0, window_bounds = array<i64: 8, 128>}, {pipeline_mode = #tpu.pipeline_mode<synchronous>, transform_indices = @transform_1, window_bounds = array<i64: 128, 256>}, {pipeline_mode = #tpu.pipeline_mode<synchronous>, transform_indices = @transform_2, window_bounds = array<i64: 1, 256>}, {pipeline_mode = #tpu.pipeline_mode<synchronous>, transform_indices = @transform_3, window_bounds = array<i64: 256, 128>}, {pipeline_mode = #tpu.pipeline_mode<synchronous>, transform_indices = @transform_4, window_bounds = array<i64: 1, 128>}, {transform_indices = @transform_5, window_bounds = array<i64: 8, 128>}]} {
    %c0 = arith.constant 0 : index
    %c0_0 = arith.constant 0 : index
    %0 = vector.load %arg1[%c0, %c0_0] : memref<8x128xf32, #tpu.memory_space<vmem>>, vector<8x128xf32>
    %c0_1 = arith.constant 0 : index
    %c0_2 = arith.constant 0 : index
    %1 = vector.load %arg2[%c0_1, %c0_2] : memref<128x256xf32, #tpu.memory_space<vmem>>, vector<128x256xf32>
    %cst = arith.constant dense<0.000000e+00> : vector<8x256xf32>
    %2 = tpu.matmul %0, %1, %cst {dimension_numbers = #tpu.dot_dimension_numbers<[1], [0], [0], [1], [0, 0, 1, 1], [], []>} : vector<8x128xf32>, vector<128x256xf32>, vector<8x256xf32> -> vector<8x256xf32>
    %c0_3 = arith.constant 0 : index
    %c0_4 = arith.constant 0 : index
    %3 = vector.load %arg3[%c0_3, %c0_4] : memref<1x256xf32, #tpu.memory_space<vmem>>, vector<1x256xf32>
    %4 = vector.broadcast %3 : vector<1x256xf32> to vector<8x256xf32>
    %5 = arith.addf %2, %4 : vector<8x256xf32>
    %cst_5 = arith.constant 5.000000e-01 : f32
    %6 = vector.broadcast %cst_5 : f32 to vector<8x256xf32>
    %7 = arith.mulf %6, %5 : vector<8x256xf32>
    %cst_6 = arith.constant 0.707106769 : f32
    %8 = vector.broadcast %cst_6 : f32 to vector<8x256xf32>
    %9 = arith.mulf %5, %8 : vector<8x256xf32>
    %cst_7 = arith.constant 0.000000e+00 : f32
    %10 = vector.broadcast %cst_7 : f32 to vector<8x256xf32>
    %11 = arith.cmpf oge, %9, %10 : vector<8x256xf32>
    %cst_8 = arith.constant 1.000000e+00 : f32
    %cst_9 = arith.constant -1.000000e+00 : f32
    %12 = vector.broadcast %cst_8 : f32 to vector<8x256xf32>
    %13 = vector.broadcast %cst_9 : f32 to vector<8x256xf32>
    %14 = arith.select %11, %12, %13 : vector<8x256xi1>, vector<8x256xf32>
    %15 = math.absf %9 : vector<8x256xf32>
    %cst_10 = arith.constant 0.327591091 : f32
    %16 = vector.broadcast %cst_10 : f32 to vector<8x256xf32>
    %17 = arith.mulf %16, %15 : vector<8x256xf32>
    %cst_11 = arith.constant 1.000000e+00 : f32
    %18 = vector.broadcast %cst_11 : f32 to vector<8x256xf32>
    %19 = arith.addf %18, %17 : vector<8x256xf32>
    %cst_12 = arith.constant 1.000000e+00 : f32
    %20 = vector.broadcast %cst_12 : f32 to vector<8x256xf32>
    %21 = arith.divf %20, %19 : vector<8x256xf32>
    %cst_13 = arith.constant 1.06140542 : f32
    %22 = vector.broadcast %cst_13 : f32 to vector<8x256xf32>
    %23 = arith.mulf %22, %21 : vector<8x256xf32>
    %cst_14 = arith.constant -1.45315206 : f32
    %24 = vector.broadcast %cst_14 : f32 to vector<8x256xf32>
    %25 = arith.addf %23, %24 : vector<8x256xf32>
    %26 = arith.mulf %25, %21 : vector<8x256xf32>
    %cst_15 = arith.constant 1.42141378 : f32
    %27 = vector.broadcast %cst_15 : f32 to vector<8x256xf32>
    %28 = arith.addf %26, %27 : vector<8x256xf32>
    %29 = arith.mulf %28, %21 : vector<8x256xf32>
    %cst_16 = arith.constant -0.284496725 : f32
    %30 = vector.broadcast %cst_16 : f32 to vector<8x256xf32>
    %31 = arith.addf %29, %30 : vector<8x256xf32>
    %32 = arith.mulf %31, %21 : vector<8x256xf32>
    %cst_17 = arith.constant 0.254829586 : f32
    %33 = vector.broadcast %cst_17 : f32 to vector<8x256xf32>
    %34 = arith.addf %32, %33 : vector<8x256xf32>
    %35 = arith.mulf %34, %21 : vector<8x256xf32>
    %cst_18 = arith.constant 0.000000e+00 : f32
    %36 = vector.broadcast %cst_18 : f32 to vector<8x256xf32>
    %37 = arith.subf %36, %15 : vector<8x256xf32>
    %38 = arith.mulf %37, %15 : vector<8x256xf32>
    %39 = math.exp %38 : vector<8x256xf32>
    %40 = arith.mulf %35, %39 : vector<8x256xf32>
    %cst_19 = arith.constant 1.000000e+00 : f32
    %41 = vector.broadcast %cst_19 : f32 to vector<8x256xf32>
    %42 = arith.subf %41, %40 : vector<8x256xf32>
    %43 = arith.mulf %14, %42 : vector<8x256xf32>
    %cst_20 = arith.constant 1.000000e+00 : f32
    %44 = vector.broadcast %cst_20 : f32 to vector<8x256xf32>
    %45 = arith.addf %44, %43 : vector<8x256xf32>
    %46 = arith.mulf %7, %45 : vector<8x256xf32>
    %c0_21 = arith.constant 0 : index
    %c0_22 = arith.constant 0 : index
    %47 = vector.load %arg4[%c0_21, %c0_22] : memref<256x128xf32, #tpu.memory_space<vmem>>, vector<256x128xf32>
    %cst_23 = arith.constant dense<0.000000e+00> : vector<8x128xf32>
    %48 = tpu.matmul %46, %47, %cst_23 {dimension_numbers = #tpu.dot_dimension_numbers<[1], [0], [0], [1], [0, 0, 1, 1], [], []>} : vector<8x256xf32>, vector<256x128xf32>, vector<8x128xf32> -> vector<8x128xf32>
    %c0_24 = arith.constant 0 : index
    %c0_25 = arith.constant 0 : index
    %49 = vector.load %arg5[%c0_24, %c0_25] : memref<1x128xf32, #tpu.memory_space<vmem>>, vector<1x128xf32>
    %50 = vector.broadcast %49 : vector<1x128xf32> to vector<8x128xf32>
    %51 = arith.addf %48, %50 : vector<8x128xf32>
    %c0_26 = arith.constant 0 : index
    %c0_27 = arith.constant 0 : index
    %52 = vector.load %arg6[%c0_26, %c0_27] : memref<8x128xf32, #tpu.memory_space<vmem>>, vector<8x128xf32>
    tpu.vector_store %arg6[%c0_26, %c0_27], %51 {strides = array<i32>} : memref<8x128xf32, #tpu.memory_space<vmem>>, vector<8x128xf32>,
    return
  }
  func.func @transform_0(%arg0: i32) -> (i32, i32) {
    %c0_i32 = arith.constant 0 : i32
    %c0_i32_0 = arith.constant 0 : i32
    return %arg0, %c0_i32 : i32, i32
  }
  func.func @transform_1(%arg0: i32) -> (i32, i32) {
    %c0_i32 = arith.constant 0 : i32
    %c0_i32_0 = arith.constant 0 : i32
    %c0_i32_1 = arith.constant 0 : i32
    return %c0_i32, %c0_i32_0 : i32, i32
  }
  func.func @transform_2(%arg0: i32) -> (i32, i32) {
    %c0_i32 = arith.constant 0 : i32
    %c0_i32_0 = arith.constant 0 : i32
    %c0_i32_1 = arith.constant 0 : i32
    return %c0_i32, %c0_i32_0 : i32, i32
  }
  func.func @transform_3(%arg0: i32) -> (i32, i32) {
    %c0_i32 = arith.constant 0 : i32
    %c0_i32_0 = arith.constant 0 : i32
    %c0_i32_1 = arith.constant 0 : i32
    return %c0_i32, %c0_i32_0 : i32, i32
  }
  func.func @transform_4(%arg0: i32) -> (i32, i32) {
    %c0_i32 = arith.constant 0 : i32
    %c0_i32_0 = arith.constant 0 : i32
    %c0_i32_1 = arith.constant 0 : i32
    return %c0_i32, %c0_i32_0 : i32, i32
  }
  func.func @transform_5(%arg0: i32) -> (i32, i32) {
    %c0_i32 = arith.constant 0 : i32
    %c0_i32_0 = arith.constant 0 : i32
    return %arg0, %c0_i32 : i32, i32
  }
}

</mosaic_0001>

<bundles_post_ra>
// kernel: tpu_custom_call.1
= control target key start
LH: loop header
LB: loop body
LE: loop exit
PB: predicated region body
PF: predicated region fallthrough
CT: control target
= control target key end

     0   :  { %10 = vsyncpa [#allocation3], 0  ;;  %s1289_s0 = inlined_call_operand.hbm [shape: f32[16,128], index: 0, kind: input, shape index: {}]   ;;  %s1290_s1 = inlined_call_operand.hbm [shape: f32[128,256], index: 1, kind: input, shape index: {}]   ;;  %s1291_s2 = inlined_call_operand.vmem [shape: f32[1,256], index: 2, kind: input, shape index: {}]   ;;  %s1292_s3 = inlined_call_operand.hbm [shape: f32[256,128], index: 3, kind: input, shape index: {}]   ;;  %s1293_s4 = inlined_call_operand.vmem [shape: f32[1,128], index: 4, kind: input, shape index: {}]   ;;  %s1294_s5 = inlined_call_operand.hbm [shape: f32[16,128], index: 5, kind: output, shape index: {}]  }
   0x1   :  { %12 = vsyncpa [#allocation3 + $0x1], 0 }
   0x2   :  { %13 = vsyncpa [#allocation6], 0 }
   0x3   :  { %14 = vsyncpa [#allocation4], 0 }
   0x4   :  { %16 = vsyncpa [#allocation4 + $0x1], 0  ;;  %s1047_s18 = smov 0   ;;  %s1049_s19 = smov 0  }
   0x5   :  { %s1051_s20 = smov 0   ;;  %s1053_s21 = smov 0  }
   0x6 LB: > { %s1068_s22 = sadd.s32 4294967295, %s1005_s21   ;;  %s652_s23 = sadd.s32 4294967294, %s1005_s21   ;;  %s1005_s21 = sphi %s1053_s21, %s1314_s21   ;;  %s1001_s20 = sphi %s1051_s20, %s1313_s20   ;;  %s997_s19 = sphi %s1049_s19, %s1312_s19   ;;  %s993_s18 = sphi %s1047_s18, %s1311_s18  }
   0x7   : > { %p42_p0 = scmp.ne.s32.totalorder %s997_s19, %s993_s18  ;;  %p1295_p1 = scmp.eq.s32.totalorder %s1068_s22, 0 }
   0x8   : > { %p156_p3 = scmp.eq.s32.totalorder %s652_s23, 1  ;;  %p653_p5 = scmp.ge.s32.totalorder %s1005_s21, 1 }
   0x9   : > { %p1077_p4 = por %p1295_p1, %p42_p0  ;;  %p163_p7 = scmp.lt.s32.totalorder %s1005_s21, 3 }
   0xa   : > { %p1082_p6 = por %p156_p3, %p42_p0  ;;  %s1007_s27 = smov [#allocation5]  }
   0xb   : > { %s1298_s24 = scalar_select %p1077_p4, 1, 0 }
   0xc   : > { %s1299_s25 = scalar_select %p1082_p6, 1, 0 }
   0xd   : > { %p1087_p8 = pnand %p653_p5, %p163_p7  ;;  %s175_s28 = sshll.u32 %s1007_s27, 4  ;;  %s1091_s28 = int_to_ptr.vmem [resolvable:$true] %s175_s28 }
   0xe   : > { %s1008_s30 = smov [#allocation7]   ;;  %s849_s9 = scalar_lea.hbm %s1290_s1, 4096 }
   0xf   : > { %p780_p9 = pneg %p1087_p8  ;;  %s191_s6 = sshll.u32 %s1008_s30, 4  ;;  %s1102_s6 = int_to_ptr.vmem [resolvable:$true] %s191_s6 }
  0x10   : > { %p850_p12 = scmp.ne.s32.totalorder %s1290_s1, %s849_s9  ;;  %p856_p5 = scmp.lt.u32.totalorder %s849_s9, %s1290_s1 }
  0x11   : > { %p1098_p11 = pnand %p780_p9, %p1295_p1 }
  0x13   : > { %p851_p13 = pneg %p1098_p11 }
  0x15   : > { %p852_p0 = pnand %p851_p13, %p850_p12 }
  0x17   : > { %p853_p3 = pneg %p852_p0 }
  0x19   : > { %p858_p7 = pnand %p856_p5, %p853_p3 }
  0x1b   : > { %861 = shalt.err (!%p858_p7)
}
  0x1c   : > { %s862_s14 = scalar_lea.vmem %s1091_s28, 4096  ;;  %p870_p2 = scmp.lt.s32.totalorder %s1091_s28, %s1091_s28 }
  0x1d   : > { %p863_p9 = scmp.ne.s32.totalorder %s1091_s28, %s862_s14  ;;  %p871_p12 = scmp.lt.s32.totalorder %s862_s14, %s862_s14 }
  0x1f   : > { %p865_p10 = pnand %p863_p9, %p851_p13  ;;  %p872_p0 = por %p871_p12, %p870_p2 }
  0x21   : > { %p866_p1 = pneg %p865_p10 }
  0x23   : > { %p873_p6 = pnand %p872_p0, %p866_p1 }
  0x25   : > { %876 = shalt.err (!%p873_p6)
}
  0x26   : > { %s1009_s15 = smov 256   ;;  %s1010_s16 = smov 16  }
  0x27   : > { %783 = dma.hbm_to_vmem [thread:$0]  (!%p1098_p11), %s1290_s1, 4096, %s1091_s28, [#allocation6], %s1009_s15, %s1009_s15, %s1010_s16  }
  0x28   : > { %s877_s7 = scalar_lea.hbm %s1292_s3, 4096 }
  0x29   : > { %p878_p2 = scmp.ne.s32.totalorder %s1292_s3, %s877_s7  ;;  %p884_p10 = scmp.lt.u32.totalorder %s877_s7, %s1292_s3 }
  0x2b   : > { %p880_p1 = pnand %p878_p2, %p851_p13 }
  0x2d   : > { %p881_p6 = pneg %p880_p1 }
  0x2f   : > { %p886_p3 = pnand %p884_p10, %p881_p6 }
  0x31   : > { %889 = shalt.err (!%p886_p3)
}
  0x32   : > { %s890_s28 = scalar_lea.vmem %s1102_s6, 4096  ;;  %p898_p12 = scmp.lt.s32.totalorder %s1102_s6, %s1102_s6 }
  0x33   : > { %p891_p5 = scmp.ne.s32.totalorder %s1102_s6, %s890_s28  ;;  %p899_p0 = scmp.lt.s32.totalorder %s890_s28, %s890_s28 }
  0x35   : > { %p893_p7 = pnand %p891_p5, %p851_p13  ;;  %p900_p2 = por %p899_p0, %p898_p12 }
  0x37   : > { %p894_p9 = pneg %p893_p7 }
  0x39   : > { %p901_p1 = pnand %p900_p2, %p894_p9 }
  0x3b   : > { %904 = shalt.err (!%p901_p1)
}
  0x3c   : > { %s1011_s12 = smov 128   ;;  %s1012_s13 = smov 8  }
  0x3d   : > { %786 = dma.hbm_to_vmem [thread:$0]  (!%p1098_p11), %s1292_s3, 4096, %s1102_s6, [#allocation6], %s1011_s12, %s1011_s12, %s1012_s13  }
  0x3e   : > { %s1157_s16 = sadd.s32 1, %s1005_s21   ;;  %s29_s23 = sadd.s32 1, %s1001_s20 }
  0x3f   : > { %s26_s17 = ssub.s32 %s1005_s21, %s1157_s16  ;;  %p36_p6 = scmp.ne.s32.totalorder %s1001_s20, %s997_s19 }
  0x40   : > { %p27_p13 = scmp.eq.s32.totalorder %s26_s17, 0  ;;  %p37_p10 = scmp.eq.s32.totalorder %s1005_s21, 0 }
  0x41   : > { %p1302_p5 = scmp.eq.s32.totalorder %s1068_s22, 1  ;;  %p797_p9 = scmp.lt.s32.totalorder %s1005_s21, 2 }
  0x42   : > { %s1166_s27 = scalar_select %p27_p13, %s1001_s20, %s29_s23  }
  0x43   : > { %p38_p3 = por %p37_p10, %p36_p6  ;;  %p1170_p7 = por %p1302_p5, %p36_p6 }
  0x44   : > { %s208_s29 = sand.u32 1, %s1001_s20   ;;  %s658_s6 = sshll.u32 %s1005_s21, 7 }
  0x45   : > { %s1303_s30 = scalar_select %p1170_p7, 1, 0 }
  0x46   : > { %s657_s7 = sshll.u32 %s208_s29, 3  ;;  %s1180_s10 = scalar_lea.hbm %s1289_s0, %s658_s6 }
  0x47   : > { %s212_s11 = scalar_lea.vmem [#allocation2], %s657_s7  ;;  %p1184_p11 = pnand %p797_p9, %p38_p3 }
  0x48   : > { %s219_s28 = sshll.u32 %s212_s11, 4  ;;  %s209_s13 = scalar_lea.sflag [#allocation3], %s208_s29  ;;  %s1182_s28 = int_to_ptr.vmem [resolvable:$true] %s219_s28 }
  0x49   : > { %s905_s14 = scalar_lea.hbm %s1180_s10, 128  ;;  %p907_p0 = pneg %p1184_p11 }
  0x4a   : > { %p906_p12 = scmp.ne.s32.totalorder %s1180_s10, %s905_s14  ;;  %s910_s23 = scalar_lea.hbm %s1289_s0, 256 }
  0x4b   : > { %p911_p13 = scmp.lt.u32.totalorder %s1180_s10, %s1289_s0  ;;  %p912_p6 = scmp.lt.u32.totalorder %s910_s23, %s905_s14 }
  0x4c   : > { %p908_p2 = pnand %p907_p0, %p906_p12  ;;  %p914_p3 = scmp.lt.u32.totalorder %s905_s14, %s1180_s10 }
  0x4d   : > { %p913_p10 = por %p912_p6, %p911_p13 }
  0x4e   : > { %p909_p1 = pneg %p908_p2 }
  0x4f   : > { %p915_p5 = por %p914_p3, %p913_p10 }
  0x51   : > { %p916_p9 = pnand %p915_p5, %p909_p1 }
  0x53   : > { %919 = shalt.err (!%p916_p9)
}
  0x54   : > { %s920_s29 = scalar_lea.vmem %s1182_s28, 128  ;;  %s1013_s8 = smov [#allocation2]  }
  0x55   : > { %p921_p12 = scmp.ne.s32.totalorder %s1182_s28, %s920_s29  ;;  %s925_s9 = sshll.u32 %s1013_s8, 4  ;;  %s926_s9 = int_to_ptr.vmem [resolvable:$false] %s925_s9 }
  0x56   : > { %s927_s11 = scalar_lea.vmem %s926_s9, 256  ;;  %p928_p4 = scmp.lt.s32.totalorder %s1182_s28, %s926_s9 }
  0x57   : > { %p923_p2 = pnand %p921_p12, %p907_p0  ;;  %p929_p13 = scmp.lt.s32.totalorder %s927_s11, %s920_s29 }
  0x59   : > { %p924_p7 = pneg %p923_p2  ;;  %p930_p6 = por %p929_p13, %p928_p4 }
  0x5b   : > { %p931_p10 = pnand %p930_p6, %p924_p7 }
  0x5d   : > { %934 = shalt.err (!%p931_p10)
}
  0x5e   : > { %790 = dma.hbm_to_vmem [thread:$0]  (!%p1184_p11), %s1180_s10, 128, %s1182_s28, %s209_s13  }
  0x5f   : > { %228 = sbr.rel (%p1087_p8) target bundleno = 635 (0x27b), region = 40  ;;  %s1216_s14 = sand.u32 (!%p1087_p8), 1, %s997_s19  }
  0x60   : > { %s660_s15 = sshll.u32 (!%p1087_p8), %s1216_s14, 3  ;;  %s231_s17 = scalar_lea.sflag (!%p1087_p8), [#allocation3], %s1216_s14 }
  0x61   : > { %s1222_s23 = scalar_lea.vmem (!%p1087_p8), [#allocation2], %s660_s15  ;;  %p1305_p4 = scmp.ne.s32.totalorder (!%p1087_p8), %s1298_s24, 0 }
  0x66   : > { %980 = dma.done.wait (%p1305_p4), %s231_s17, 128  }
  0x67   : > { %982 = vsyncadd (%p1305_p4), %s231_s17, 4294967168  ;;  %p1306_p7 = scmp.eq.s32.totalorder %s1068_s22, 0 }
  0x69   : > { %984 = dma.done.wait (%p1306_p7), [#allocation6], 8192   ;;  %p1307_p8 = pmov %p1306_p7 }
  0x6a   : > { %v1014_v0 = vmov 0.0   ;;  %v271_v1 = vld [vmem:[#allocation5 + $0x8] sm:$0xff]  ;;  %v273_v2 = vld [vmem:[#allocation5 + $0x18] sm:$0xff]  ;;  %v270_v3 = vld [vmem:[#allocation5] sm:$0xff]  ;;  %s666_s12 = sshll.u32 %s1068_s22, 7  ;;  %s268_s13 = scalar_lea.vmem [#allocation8], %s660_s15 }
  0x6b   : > { %986 = vsyncadd (%p1307_p8), [#allocation6], 4294959104  ;;  %378 = vmatprep.mubr.f32.mxu0 %v1014_v0  ;;  %v704_v4 = vpack.c.bf16 %v273_v2, %v271_v1  ;;  %v272_v5 = vld [vmem:[#allocation5 + $0x10] sm:$0xff]  ;;  %v275_v6 = vld [vmem:[#allocation5 + $0x28] sm:$0xff]  ;;  %s563_s7 = sshll.u32 %s268_s13, 4  ;;  %s1245_s8 = scalar_lea.hbm %s1294_s5, %s666_s12  ;;  %s1247_s7 = int_to_ptr.vmem [resolvable:$true] %s563_s7 }
  0x6c   : > { %v277_v7 = vld [vmem:[#allocation5 + $0x38] sm:$0xff]  ;;  %v706_v8 = vpack.c.bf16 %v272_v5, %v270_v3  ;;  %v274_v10 = vld [vmem:[#allocation5 + $0x20] sm:$0xff]  ;;  %v276_v11 = vld [vmem:[#allocation5 + $0x30] sm:$0xff]  ;;  %s550_s9 = scalar_lea.sflag [#allocation4], %s1216_s14  ;;  %s935_s11 = scalar_lea.vmem %s1247_s7, 128 }
  0x6d   : > { %v708_v9 = vpack.c.bf16 %v277_v7, %v275_v6  ;;  %v279_v12 = vld [vmem:[#allocation5 + $0x48] sm:$0xff]  ;;  %705 = vmatprep.subr.bf16.mxu0 %v704_v4  ;;  %v281_v13 = vld [vmem:[#allocation5 + $0x58] sm:$0xff]  ;;  %v710_v14 = vpack.c.bf16 %v276_v11, %v274_v10  ;;  %v278_v16 = vld [vmem:[#allocation5 + $0x40] sm:$0xff]  ;;  %p936_p11 = scmp.ne.s32.totalorder %s1247_s7, %s935_s11  ;;  %p1308_p0 = scmp.ne.s32.totalorder %s1303_s30, 0 }
  0x6e   : > { %707 = vmatpush1.bf16.msra.mxu0 %v706_v8  ;;  %v712_v15 = vpack.c.bf16 %v281_v13, %v279_v12  ;;  %v280_v17 = vld [vmem:[#allocation5 + $0x50] sm:$0xff]  ;;  %v283_v18 = vld [vmem:[#allocation5 + $0x68] sm:$0xff]  ;;  %v285_v19 = vld [vmem:[#allocation5 + $0x78] sm:$0xff]  ;;  %s1016_s22 = smov [#allocation8]  }
  0x6f   : > { %709 = vmatprep.subr.bf16.mxu0 %v708_v9  ;;  %v714_v20 = vpack.c.bf16 %v280_v17, %v278_v16  ;;  %v716_v21 = vpack.c.bf16 %v285_v19, %v283_v18  ;;  %v282_v22 = vld [vmem:[#allocation5 + $0x60] sm:$0xff]  ;;  %v284_v23 = vld [vmem:[#allocation5 + $0x70] sm:$0xff]  ;;  %v287_v24 = vld [vmem:[#allocation5 + $0x88] sm:$0xff]  ;;  %p937_p1 = pnand %p936_p11, %p1308_p0  ;;  %s939_s15 = sshll.u32 %s1016_s22, 4  ;;  %s940_s15 = int_to_ptr.vmem [resolvable:$false] %s939_s15 }
  0x70   : > { %v289_v25 = vld [vmem:[#allocation5 + $0x98] sm:$0xff]  ;;  %v718_v26 = vpack.c.bf16 %v284_v23, %v282_v22  ;;  %v286_v28 = vld [vmem:[#allocation5 + $0x80] sm:$0xff]  ;;  %v288_v29 = vld [vmem:[#allocation5 + $0x90] sm:$0xff]  ;;  %s941_s17 = scalar_lea.vmem %s940_s15, 256  ;;  %p942_p5 = scmp.lt.s32.totalorder %s1247_s7, %s940_s15 }
  0x71   : > { %v720_v27 = vpack.c.bf16 %v289_v25, %v287_v24  ;;  %v291_v30 = vld [vmem:[#allocation5 + $0xa8] sm:$0xff]  ;;  %v293_v31 = vld [vmem:[#allocation5 + $0xb8] sm:$0xff]  ;;  %v722_v32 = vpack.c.bf16 %v288_v29, %v286_v28  ;;  %v290_v34 = vld [vmem:[#allocation5 + $0xa0] sm:$0xff]  ;;  %p938_p3 = pneg %p937_p1  ;;  %p943_p9 = scmp.lt.s32.totalorder %s941_s17, %s935_s11 }
  0x72   : > { %711 = vmatpush1.bf16.msra.mxu0 %v710_v14  ;;  %v724_v33 = vpack.c.bf16 %v293_v31, %v291_v30  ;;  %v292_v35 = vld [vmem:[#allocation5 + $0xb0] sm:$0xff]  ;;  %v295_v36 = vld [vmem:[#allocation5 + $0xc8] sm:$0xff]  ;;  %v297_v37 = vld [vmem:[#allocation5 + $0xd8] sm:$0xff] }
  0x73   : > { %713 = vmatprep.subr.bf16.mxu0 %v712_v15  ;;  %v726_v38 = vpack.c.bf16 %v292_v35, %v290_v34  ;;  %v728_v39 = vpack.c.bf16 %v297_v37, %v295_v36  ;;  %v294_v40 = vld [vmem:[#allocation5 + $0xc0] sm:$0xff]  ;;  %v296_v41 = vld [vmem:[#allocation5 + $0xd0] sm:$0xff]  ;;  %v299_v42 = vld [vmem:[#allocation5 + $0xe8] sm:$0xff]  ;;  %v304_v34 = vlaneseq  ;;  %p944_p12 = por %p943_p9, %p942_p5 }
  0x74   : > { %v301_v43 = vld [vmem:[#allocation5 + $0xf8] sm:$0xff]  ;;  %v730_v44 = vpack.c.bf16 %v296_v41, %v294_v40  ;;  %v298_v46 = vld [vmem:[#allocation5 + $0xe0] sm:$0xff]  ;;  %v300_v47 = vld [vmem:[#allocation5 + $0xf0] sm:$0xff] }
  0x75   : > { %v732_v45 = vpack.c.bf16 %v301_v43, %v299_v42  ;;  %v734_v48 = vpack.c.bf16 %v300_v47, %v298_v46  ;;  %v269_v49 = vld [vmem:[%s1222_s23] sm:$0xff]  ;;  %v455_v50 = vld [vmem:[#allocation7 + $0x80] sm:$0xff]  ;;  %v456_v51 = vld [vmem:[#allocation7 + $0x88] sm:$0xff]  ;;  %v305_v35 = vshrl.u32 %v304_v34, 7  ;;  %p945_p2 = pnand %p944_p12, %p938_p3 }
  0x76   : > { %715 = vmatpush1.bf16.msra.mxu0 %v714_v20  ;;  %v439_v52 = vld [vmem:[#allocation7] sm:$0xff]  ;;  %v736_v53 = vpack.c.bf16 %v456_v51, %v455_v50  ;;  %v440_v54 = vld [vmem:[#allocation7 + $0x8] sm:$0xff]  ;;  %v457_v55 = vld [vmem:[#allocation7 + $0x90] sm:$0xff] }
  0x77   : > { %717 = vmatprep.subr.bf16.mxu0 %v716_v21  ;;  %v458_v56 = vld [vmem:[#allocation7 + $0x98] sm:$0xff]  ;;  %v738_v57 = vpack.c.bf16 %v440_v54, %v439_v52  ;;  %v441_v59 = vld [vmem:[#allocation7 + $0x10] sm:$0xff]  ;;  %v459_v61 = vld [vmem:[#allocation7 + $0xa0] sm:$0xff]  ;;  %v306_v36 = vsub.s32 0, %v305_v35 }
  0x78   : > { %v740_v58 = vpack.c.bf16 %v458_v56, %v457_v55  ;;  %v442_v60 = vld [vmem:[#allocation7 + $0x18] sm:$0xff]  ;;  %737 = vmatprep.subr.bf16.mxu1 %v736_v53  ;;  %v460_v62 = vld [vmem:[#allocation7 + $0xa8] sm:$0xff]  ;;  %v443_v1 = vld [vmem:[#allocation7 + $0x20] sm:$0xff] }
  0x79   : > { %739 = vmatpush3.bf16.msra.mxu1 %v738_v57  ;;  %v742_v63 = vpack.c.bf16 %v442_v60, %v441_v59  ;;  %v744_v0 = vpack.c.bf16 %v460_v62, %v459_v61  ;;  %v444_v2 = vld [vmem:[#allocation7 + $0x28] sm:$0xff]  ;;  %v461_v3 = vld [vmem:[#allocation7 + $0xb0] sm:$0xff]  ;;  %v462_v4 = vld [vmem:[#allocation7 + $0xb8] sm:$0xff] }
  0x7a   : > { %719 = vmatpush1.bf16.msra.mxu0 %v718_v26  ;;  %741 = vmatprep.subr.bf16.mxu1 %v740_v58  ;;  %v746_v5 = vpack.c.bf16 %v444_v2, %v443_v1  ;;  %v748_v6 = vpack.c.bf16 %v462_v4, %v461_v3  ;;  %v445_v7 = vld [vmem:[#allocation7 + $0x30] sm:$0xff]  ;;  %v446_v8 = vld [vmem:[#allocation7 + $0x38] sm:$0xff]  ;;  %v463_v9 = vld [vmem:[#allocation7 + $0xc0] sm:$0xff] }
  0x7b   : > { %721 = vmatprep.subr.bf16.mxu0 %v720_v27  ;;  %v464_v10 = vld [vmem:[#allocation7 + $0xc8] sm:$0xff]  ;;  %v750_v11 = vpack.c.bf16 %v446_v8, %v445_v7  ;;  %v447_v13 = vld [vmem:[#allocation7 + $0x40] sm:$0xff]  ;;  %v465_v15 = vld [vmem:[#allocation7 + $0xd0] sm:$0xff] }
  0x7c   : > { %v752_v12 = vpack.c.bf16 %v464_v10, %v463_v9  ;;  %v448_v14 = vld [vmem:[#allocation7 + $0x48] sm:$0xff]  ;;  %v466_v16 = vld [vmem:[#allocation7 + $0xd8] sm:$0xff]  ;;  %v449_v19 = vld [vmem:[#allocation7 + $0x50] sm:$0xff] }
  0x7d   : > { %743 = vmatpush3.bf16.msra.mxu1 %v742_v63  ;;  %v754_v17 = vpack.c.bf16 %v448_v14, %v447_v13  ;;  %v756_v18 = vpack.c.bf16 %v466_v16, %v465_v15  ;;  %v450_v20 = vld [vmem:[#allocation7 + $0x58] sm:$0xff]  ;;  %v467_v21 = vld [vmem:[#allocation7 + $0xe0] sm:$0xff]  ;;  %v468_v22 = vld [vmem:[#allocation7 + $0xe8] sm:$0xff] }
  0x7e   : > { %723 = vmatpush1.bf16.msra.mxu0 %v722_v32  ;;  %745 = vmatprep.subr.bf16.mxu1 %v744_v0  ;;  %v758_v23 = vpack.c.bf16 %v450_v20, %v449_v19  ;;  %v760_v24 = vpack.c.bf16 %v468_v22, %v467_v21  ;;  %v451_v25 = vld [vmem:[#allocation7 + $0x60] sm:$0xff]  ;;  %v452_v26 = vld [vmem:[#allocation7 + $0x68] sm:$0xff]  ;;  %v469_v27 = vld [vmem:[#allocation7 + $0xf0] sm:$0xff]  ;;  %v1015_v20 = vmov -1.0  }
  0x7f   : > { %725 = vmatprep.subr.bf16.mxu0 %v724_v33  ;;  %v470_v28 = vld [vmem:[#allocation7 + $0xf8] sm:$0xff]  ;;  %v762_v29 = vpack.c.bf16 %v452_v26, %v451_v25  ;;  %v453_v31 = vld [vmem:[#allocation7 + $0x70] sm:$0xff] }
  0x80   : > { %v764_v30 = vpack.c.bf16 %v470_v28, %v469_v27  ;;  %v454_v32 = vld [vmem:[#allocation7 + $0x78] sm:$0xff]  ;;  %v302_v37 = vld [vmem:[%s1291_s2] sm:$0x3] }
  0x81   : > { %747 = vmatpush3.bf16.msra.mxu1 %v746_v5  ;;  %v766_v33 = vpack.c.bf16 %v454_v32, %v453_v31 }
  0x82   : > { %727 = vmatpush1.bf16.msra.mxu0 %v726_v38  ;;  %749 = vmatprep.subr.bf16.mxu1 %v748_v6  ;;  %v310_v38 = vsub.s32 1, %v305_v35 }
  0x83   : > { %729 = vmatprep.subr.bf16.mxu0 %v728_v39  ;;  %v307_v39 = vrot.slane %v302_v37, %v306_v36 }
  0x84   : > { %v311_v40 = vrot.slane %v302_v37, %v310_v38 }
  0x85   : > { %751 = vmatpush3.bf16.msra.mxu1 %v750_v11 }
  0x86   : > { %731 = vmatpush1.bf16.msra.mxu0 %v730_v44  ;;  %753 = vmatprep.subr.bf16.mxu1 %v752_v12 }
  0x87   : > { %733 = vmatprep.subr.bf16.mxu0 %v732_v45 }
  0x89   : > { %755 = vmatpush3.bf16.msra.mxu1 %v754_v17 }
  0x8a   : > { %735 = vmatpush1.bf16.msra.mxu0 %v734_v48  ;;  %757 = vmatprep.subr.bf16.mxu1 %v756_v18 }
  0x8d   : > { %379 = vmatmul.mubr.f32.vlgmr.msra.gmra.mrb[0].mxu0 %v269_v49  ;;  %759 = vmatpush3.bf16.msra.mxu1 %v758_v23 }
  0x8e   : > { %761 = vmatprep.subr.bf16.mxu1 %v760_v24 }
  0x91   : > { %763 = vmatpush3.bf16.msra.mxu1 %v762_v29 }
  0x92   : > { %765 = vmatprep.subr.bf16.mxu1 %v764_v30 }
  0x95   : > { %767 = vmatpush3.bf16.msra.mxu1 %v766_v33  ;;  %v664_v33 = vld [vmem:[%s1293_s4] ss:$0 sm:$0xff] }
 0x160   : > { %v380_v41 = vpop.f32.mrb[0].mxu0 }
 0x161   : > { %v381_v42 = vadd.f32 %v380_v41, %v307_v39  ;;  %v382_v43 = vpop.f32.mrb[1].mxu0 }
 0x162   : > { %v383_v44 = vadd.f32 %v382_v43, %v311_v40 }
 0x163   : > { %v387_v45 = vmul.f32 0.70710677, %v381_v42  ;;  %v385_v29 = vmul.f32 0.5, %v381_v42 }
 0x164   : > { %v388_v46 = vmul.f32 0.70710677, %v383_v44  ;;  %v386_v27 = vmul.f32 0.5, %v383_v44 }
 0x165   : > { %v393_v47 = vand.u32 2147483647, %v387_v45  ;;  %vm389_vm0 = vcmp.ge.f32.partialorder %v387_v45, 0.0 }
 0x166   : > { %v394_v48 = vand.u32 2147483647, %v388_v46  ;;  %vm390_vm1 = vcmp.ge.f32.partialorder %v388_v46, 0.0  ;;  %v391_v21 = vsel %vm389_vm0, 1.0, %v1015_v20 }
 0x167   : > { %v395_v49 = vmul.f32 0.3275911, %v393_v47  ;;  %v421_v53 = vsub.f32 0.0, %v393_v47  ;;  %v392_v23 = vsel %vm390_vm1, 1.0, %v1015_v20 }
 0x168   : > { %v396_v50 = vmul.f32 0.3275911, %v394_v48  ;;  %v422_v54 = vsub.f32 0.0, %v394_v48 }
 0x169   : > { %v397_v51 = vadd.f32 1.0, %v395_v49  ;;  %v423_v56 = vmul.f32 %v421_v53, %v393_v47 }
 0x16a   : > { %v398_v52 = vadd.f32 1.0, %v396_v50  ;;  %v424_v58 = vmul.f32 %v422_v54, %v394_v48 }
 0x16b   : > { %841 = vrcp.f32 %v397_v51  ;;  %v425_v62 = vmul.f32 1.442695, %v423_v56 }
 0x16c   : > { %843 = vrcp.f32 %v398_v52  ;;  %v427_v0 = vmul.f32 1.442695, %v424_v58 }
 0x16d   : > { %845 = vpow2.f32 %v425_v62 }
 0x16e   : > { %847 = vpow2.f32 %v427_v0 }
 0x175   : > { %v842_v55 = vpop.eup %841 }
 0x176   : > { %v844_v57 = vpop.eup %843  ;;  %v403_v59 = vmul.f32 1.0614054, %v842_v55 }
 0x177   : > { %v404_v60 = vmul.f32 1.0614054, %v844_v57  ;;  %v846_v14 = vpop.eup %845 }
 0x178   : > { %v405_v61 = vadd.f32 -1.4531521, %v403_v59  ;;  %v848_v16 = vpop.eup %847 }
 0x179   : > { %v406_v63 = vadd.f32 -1.4531521, %v404_v60 }
 0x17a   : > { %v407_v1 = vmul.f32 %v842_v55, %v405_v61 }
 0x17b   : > { %v408_v2 = vmul.f32 %v844_v57, %v406_v63 }
 0x17c   : > { %v409_v3 = vadd.f32 1.4214138, %v407_v1 }
 0x17d   : > { %v410_v4 = vadd.f32 1.4214138, %v408_v2 }
 0x17e   : > { %v411_v5 = vmul.f32 %v842_v55, %v409_v3 }
 0x17f   : > { %v412_v6 = vmul.f32 %v844_v57, %v410_v4 }
 0x180   : > { %v413_v7 = vadd.f32 -0.28449672, %v411_v5 }
 0x181   : > { %v414_v8 = vadd.f32 -0.28449672, %v412_v6 }
 0x182   : > { %v415_v9 = vmul.f32 %v842_v55, %v413_v7 }
 0x183   : > { %v416_v10 = vmul.f32 %v844_v57, %v414_v8 }
 0x184   : > { %v417_v11 = vadd.f32 0.2548296, %v415_v9 }
 0x185   : > { %v418_v12 = vadd.f32 0.2548296, %v416_v10 }
 0x186   : > { %v419_v13 = vmul.f32 %v842_v55, %v417_v11 }
 0x187   : > { %v420_v15 = vmul.f32 %v844_v57, %v418_v12 }
 0x188   : > { %v429_v17 = vmul.f32 %v846_v14, %v419_v13 }
 0x189   : > { %v430_v18 = vmul.f32 %v848_v16, %v420_v15 }
 0x18a   : > { %v431_v19 = vsub.f32 1.0, %v429_v17 }
 0x18b   : > { %v432_v22 = vsub.f32 1.0, %v430_v18 }
 0x18c   : > { %v433_v24 = vmul.f32 %v431_v19, %v391_v21 }
 0x18d   : > { %v434_v25 = vmul.f32 %v432_v22, %v392_v23 }
 0x18e   : > { %v435_v26 = vadd.f32 1.0, %v433_v24 }
 0x18f   : > { %v436_v28 = vadd.f32 1.0, %v434_v25 }
 0x190   : > { %v437_v31 = vmul.f32 %v435_v26, %v385_v29 }
 0x191   : > { %v438_v30 = vmul.f32 %v436_v28, %v386_v27 }
 0x193   : > { %542 = vmatprep.mubr.f32.mxu1 %v438_v30 }
 0x194   : > { %543 = vmatmul.mubr.f32.vlgmr.msra.gmra.mrb[0].mxu1 %v437_v31 }
 0x267   : > { %v701_v32 = vpop.f32.mrb[0].mxu1 }
 0x268   : > { %v702_v34 = vpop.f32.mrb[1].mxu1 }
 0x269   : > { %v703_v35 = vadd.f32 %v702_v34, %v701_v32 }
 0x26b   : > { %v545_v36 = vadd.f32 %v703_v35, %v664_v33 }
 0x26d   : > { %548 = vst [vmem:[%s268_s13] sm:$0xff] %v545_v36 }
 0x26e   : > { %948 = shalt.err (!%p945_p2)
}
 0x26f   : > { %s949_s14 = scalar_lea.hbm %s1245_s8, 128  ;;  %s953_s26 = scalar_lea.hbm %s1294_s5, 256 }
 0x270   : > { %p950_p13 = scmp.ne.s32.totalorder %s1245_s8, %s949_s14  ;;  %p954_p4 = scmp.lt.u32.totalorder %s1245_s8, %s1294_s5 }
 0x271   : > { %p955_p7 = scmp.lt.u32.totalorder %s953_s26, %s949_s14  ;;  %p957_p11 = scmp.lt.u32.totalorder %s949_s14, %s1245_s8 }
 0x272   : > { %p951_p6 = pnand %p950_p13, %p1308_p0 }
 0x273   : > { %p956_p8 = por %p955_p7, %p954_p4 }
 0x274   : > { %p952_p10 = pneg %p951_p6 }
 0x275   : > { %p958_p1 = por %p957_p11, %p956_p8 }
 0x277   : > { %p959_p3 = pnand %p958_p1, %p952_p10 }
 0x279   : > { %962 = shalt.err (!%p959_p3)
}
 0x27a   : > { %778 = dma.vmem_to_hbm [thread:$0]  (%p1308_p0), %s1247_s7, 128, %s1245_s8, %s550_s9  }
 0x27b PF: > { %s575_s12 = sand.u32 1, %s993_s18   ;;  %p1309_p5 = scmp.ne.s32.totalorder %s1299_s25, 0 }
 0x27c   : > { %p1310_p9 = scmp.ge.s32.totalorder %s1005_s21, 2  ;;  %s576_s13 = scalar_lea.sflag [#allocation4], %s575_s12 }
 0x27e   : > { %p792_p12 = pnand %p1310_p9, %p1309_p5 }
 0x280   : > { %988 = dma.done.wait (!%p792_p12), %s576_s13, 128  }
 0x281   : > { %990 = vsyncadd (!%p792_p12), %s576_s13, 4294967168  ;;  %p19_p2 = scmp.ge.s32.totalorder %s1157_s16, 4   ;;  %s1311_s18 = smov %s997_s19 }
 0x282   : > { %s1312_s19 = smov %s1001_s20  ;;  %s1313_s20 = smov %s1166_s27 }
 0x283   : > { %s1314_s21 = smov %s1157_s16  ;;  %21 = sbr.rel (!%p19_p2) target bundleno = 6 (0x6), region = 93 }
 0x28a   :  { %581 = vsyncpa [#allocation3], 1 }
 0x28b   :  { %583 = vsyncpa [#allocation3 + $0x1], 1 }
 0x28c   :  { %584 = vsyncpa [#allocation6], 1 }
 0x28d   :  { %585 = vsyncpa [#allocation4], 1 }
 0x28e   :  { %587 = vsyncpa [#allocation4 + $0x1], 1 }

// kernel: tpu_custom_call.1
= control target key start
LH: loop header
LB: loop body
LE: loop exit
PB: predicated region body
PF: predicated region fallthrough
CT: control target
= control target key end

     0   :  { %10 = vsyncpa [#allocation3], 0  ;;  %s1289_s0 = inlined_call_operand.hbm [shape: f32[16,128], index: 0, kind: input, shape index: {}]   ;;  %s1290_s1 = inlined_call_operand.hbm [shape: f32[128,256], index: 1, kind: input, shape index: {}]   ;;  %s1291_s2 = inlined_call_operand.vmem [shape: f32[1,256], index: 2, kind: input, shape index: {}]   ;;  %s1292_s3 = inlined_call_operand.hbm [shape: f32[256,128], index: 3, kind: input, shape index: {}]   ;;  %s1293_s4 = inlined_call_operand.vmem [shape: f32[1,128], index: 4, kind: input, shape index: {}]   ;;  %s1294_s5 = inlined_call_operand.hbm [shape: f32[16,128], index: 5, kind: output, shape index: {}]  }
   0x1   :  { %12 = vsyncpa [#allocation3 + $0x1], 0 }
   0x2   :  { %13 = vsyncpa [#allocation6], 0 }
   0x3   :  { %14 = vsyncpa [#allocation4], 0 }
   0x4   :  { %16 = vsyncpa [#allocation4 + $0x1], 0  ;;  %s1047_s18 = smov 0   ;;  %s1049_s19 = smov 0  }
   0x5   :  { %s1051_s20 = smov 0   ;;  %s1053_s21 = smov 0  }
   0x6 LB: > { %s1068_s22 = sadd.s32 4294967295, %s1005_s21   ;;  %s652_s23 = sadd.s32 4294967294, %s1005_s21   ;;  %s1005_s21 = sphi %s1053_s21, %s1314_s21   ;;  %s1001_s20 = sphi %s1051_s20, %s1313_s20   ;;  %s997_s19 = sphi %s1049_s19, %s1312_s19   ;;  %s993_s18 = sphi %s1047_s18, %s1311_s18  }
   0x7   : > { %p42_p0 = scmp.ne.s32.totalorder %s997_s19, %s993_s18  ;;  %p1295_p1 = scmp.eq.s32.totalorder %s1068_s22, 0 }
   0x8   : > { %p156_p3 = scmp.eq.s32.totalorder %s652_s23, 1  ;;  %p653_p5 = scmp.ge.s32.totalorder %s1005_s21, 1 }
   0x9   : > { %p1077_p4 = por %p1295_p1, %p42_p0  ;;  %p163_p7 = scmp.lt.s32.totalorder %s1005_s21, 3 }
   0xa   : > { %p1082_p6 = por %p156_p3, %p42_p0  ;;  %s1007_s27 = smov [#allocation5]  }
   0xb   : > { %s1298_s24 = scalar_select %p1077_p4, 1, 0 }
   0xc   : > { %s1299_s25 = scalar_select %p1082_p6, 1, 0 }
   0xd   : > { %p1087_p8 = pnand %p653_p5, %p163_p7  ;;  %s175_s28 = sshll.u32 %s1007_s27, 4  ;;  %s1091_s28 = int_to_ptr.vmem [resolvable:$true] %s175_s28 }
   0xe   : > { %s1008_s30 = smov [#allocation7]   ;;  %s849_s9 = scalar_lea.hbm %s1290_s1, 4096 }
   0xf   : > { %p780_p9 = pneg %p1087_p8  ;;  %s191_s6 = sshll.u32 %s1008_s30, 4  ;;  %s1102_s6 = int_to_ptr.vmem [resolvable:$true] %s191_s6 }
  0x10   : > { %p850_p12 = scmp.ne.s32.totalorder %s1290_s1, %s849_s9  ;;  %p856_p5 = scmp.lt.u32.totalorder %s849_s9, %s1290_s1 }
  0x11   : > { %p1098_p11 = pnand %p780_p9, %p1295_p1 }
  0x13   : > { %p851_p13 = pneg %p1098_p11 }
  0x15   : > { %p852_p0 = pnand %p851_p13, %p850_p12 }
  0x17   : > { %p853_p3 = pneg %p852_p0 }
  0x19   : > { %p858_p7 = pnand %p856_p5, %p853_p3 }
  0x1b   : > { %861 = shalt.err (!%p858_p7)
}
  0x1c   : > { %s862_s14 = scalar_lea.vmem %s1091_s28, 4096  ;;  %p870_p2 = scmp.lt.s32.totalorder %s1091_s28, %s1091_s28 }
  0x1d   : > { %p863_p9 = scmp.ne.s32.totalorder %s1091_s28, %s862_s14  ;;  %p871_p12 = scmp.lt.s32.totalorder %s862_s14, %s862_s14 }
  0x1f   : > { %p865_p10 = pnand %p863_p9, %p851_p13  ;;  %p872_p0 = por %p871_p12, %p870_p2 }
  0x21   : > { %p866_p1 = pneg %p865_p10 }
  0x23   : > { %p873_p6 = pnand %p872_p0, %p866_p1 }
  0x25   : > { %876 = shalt.err (!%p873_p6)
}
  0x26   : > { %s1009_s15 = smov 256   ;;  %s1010_s16 = smov 16  }
  0x27   : > { %783 = dma.hbm_to_vmem [thread:$0]  (!%p1098_p11), %s1290_s1, 4096, %s1091_s28, [#allocation6], %s1009_s15, %s1009_s15, %s1010_s16  }
  0x28   : > { %s877_s7 = scalar_lea.hbm %s1292_s3, 4096 }
  0x29   : > { %p878_p2 = scmp.ne.s32.totalorder %s1292_s3, %s877_s7  ;;  %p884_p10 = scmp.lt.u32.totalorder %s877_s7, %s1292_s3 }
  0x2b   : > { %p880_p1 = pnand %p878_p2, %p851_p13 }
  0x2d   : > { %p881_p6 = pneg %p880_p1 }
  0x2f   : > { %p886_p3 = pnand %p884_p10, %p881_p6 }
  0x31   : > { %889 = shalt.err (!%p886_p3)
}
  0x32   : > { %s890_s28 = scalar_lea.vmem %s1102_s6, 4096  ;;  %p898_p12 = scmp.lt.s32.totalorder %s1102_s6, %s1102_s6 }
  0x33   : > { %p891_p5 = scmp.ne.s32.totalorder %s1102_s6, %s890_s28  ;;  %p899_p0 = scmp.lt.s32.totalorder %s890_s28, %s890_s28 }
  0x35   : > { %p893_p7 = pnand %p891_p5, %p851_p13  ;;  %p900_p2 = por %p899_p0, %p898_p12 }
  0x37   : > { %p894_p9 = pneg %p893_p7 }
  0x39   : > { %p901_p1 = pnand %p900_p2, %p894_p9 }
  0x3b   : > { %904 = shalt.err (!%p901_p1)
}
  0x3c   : > { %s1011_s12 = smov 128   ;;  %s1012_s13 = smov 8  }
  0x3d   : > { %786 = dma.hbm_to_vmem [thread:$0]  (!%p1098_p11), %s1292_s3, 4096, %s1102_s6, [#allocation6], %s1011_s12, %s1011_s12, %s1012_s13  }
  0x3e   : > { %s1157_s16 = sadd.s32 1, %s1005_s21   ;;  %s29_s23 = sadd.s32 1, %s1001_s20 }
  0x3f   : > { %s26_s17 = ssub.s32 %s1005_s21, %s1157_s16  ;;  %p36_p6 = scmp.ne.s32.totalorder %s1001_s20, %s997_s19 }
  0x40   : > { %p27_p13 = scmp.eq.s32.totalorder %s26_s17, 0  ;;  %p37_p10 = scmp.eq.s32.totalorder %s1005_s21, 0 }
  0x41   : > { %p1302_p5 = scmp.eq.s32.totalorder %s1068_s22, 1  ;;  %p797_p9 = scmp.lt.s32.totalorder %s1005_s21, 2 }
  0x42   : > { %s1166_s27 = scalar_select %p27_p13, %s1001_s20, %s29_s23  }
  0x43   : > { %p38_p3 = por %p37_p10, %p36_p6  ;;  %p1170_p7 = por %p1302_p5, %p36_p6 }
  0x44   : > { %s208_s29 = sand.u32 1, %s1001_s20   ;;  %s658_s6 = sshll.u32 %s1005_s21, 7 }
  0x45   : > { %s1303_s30 = scalar_select %p1170_p7, 1, 0 }
  0x46   : > { %s657_s7 = sshll.u32 %s208_s29, 3  ;;  %s1180_s10 = scalar_lea.hbm %s1289_s0, %s658_s6 }
  0x47   : > { %s212_s11 = scalar_lea.vmem [#allocation2], %s657_s7  ;;  %p1184_p11 = pnand %p797_p9, %p38_p3 }
  0x48   : > { %s219_s28 = sshll.u32 %s212_s11, 4  ;;  %s209_s13 = scalar_lea.sflag [#allocation3], %s208_s29  ;;  %s1182_s28 = int_to_ptr.vmem [resolvable:$true] %s219_s28 }
  0x49   : > { %s905_s14 = scalar_lea.hbm %s1180_s10, 128  ;;  %p907_p0 = pneg %p1184_p11 }
  0x4a   : > { %p906_p12 = scmp.ne.s32.totalorder %s1180_s10, %s905_s14  ;;  %s910_s23 = scalar_lea.hbm %s1289_s0, 256 }
  0x4b   : > { %p911_p13 = scmp.lt.u32.totalorder %s1180_s10, %s1289_s0  ;;  %p912_p6 = scmp.lt.u32.totalorder %s910_s23, %s905_s14 }
  0x4c   : > { %p908_p2 = pnand %p907_p0, %p906_p12  ;;  %p914_p3 = scmp.lt.u32.totalorder %s905_s14, %s1180_s10 }
  0x4d   : > { %p913_p10 = por %p912_p6, %p911_p13 }
  0x4e   : > { %p909_p1 = pneg %p908_p2 }
  0x4f   : > { %p915_p5 = por %p914_p3, %p913_p10 }
  0x51   : > { %p916_p9 = pnand %p915_p5, %p909_p1 }
  0x53   : > { %919 = shalt.err (!%p916_p9)
}
  0x54   : > { %s920_s29 = scalar_lea.vmem %s1182_s28, 128  ;;  %s1013_s8 = smov [#allocation2]  }
  0x55   : > { %p921_p12 = scmp.ne.s32.totalorder %s1182_s28, %s920_s29  ;;  %s925_s9 = sshll.u32 %s1013_s8, 4  ;;  %s926_s9 = int_to_ptr.vmem [resolvable:$false] %s925_s9 }
  0x56   : > { %s927_s11 = scalar_lea.vmem %s926_s9, 256  ;;  %p928_p4 = scmp.lt.s32.totalorder %s1182_s28, %s926_s9 }
  0x57   : > { %p923_p2 = pnand %p921_p12, %p907_p0  ;;  %p929_p13 = scmp.lt.s32.totalorder %s927_s11, %s920_s29 }
  0x59   : > { %p924_p7 = pneg %p923_p2  ;;  %p930_p6 = por %p929_p13, %p928_p4 }
  0x5b   : > { %p931_p10 = pnand %p930_p6, %p924_p7 }
  0x5d   : > { %934 = shalt.err (!%p931_p10)
}
  0x5e   : > { %790 = dma.hbm_to_vmem [thread:$0]  (!%p1184_p11), %s1180_s10, 128, %s1182_s28, %s209_s13  }
  0x5f   : > { %228 = sbr.rel (%p1087_p8) target bundleno = 635 (0x27b), region = 40  ;;  %s1216_s14 = sand.u32 (!%p1087_p8), 1, %s997_s19  }
  0x60   : > { %s660_s15 = sshll.u32 (!%p1087_p8), %s1216_s14, 3  ;;  %s231_s17 = scalar_lea.sflag (!%p1087_p8), [#allocation3], %s1216_s14 }
  0x61   : > { %s1222_s23 = scalar_lea.vmem (!%p1087_p8), [#allocation2], %s660_s15  ;;  %p1305_p4 = scmp.ne.s32.totalorder (!%p1087_p8), %s1298_s24, 0 }
  0x66   : > { %980 = dma.done.wait (%p1305_p4), %s231_s17, 128  }
  0x67   : > { %982 = vsyncadd (%p1305_p4), %s231_s17, 4294967168  ;;  %p1306_p7 = scmp.eq.s32.totalorder %s1068_s22, 0 }
  0x69   : > { %984 = dma.done.wait (%p1306_p7), [#allocation6], 8192   ;;  %p1307_p8 = pmov %p1306_p7 }
  0x6a   : > { %v1014_v0 = vmov 0.0   ;;  %v271_v1 = vld [vmem:[#allocation5 + $0x8] sm:$0xff]  ;;  %v273_v2 = vld [vmem:[#allocation5 + $0x18] sm:$0xff]  ;;  %v270_v3 = vld [vmem:[#allocation5] sm:$0xff]  ;;  %s666_s12 = sshll.u32 %s1068_s22, 7  ;;  %s268_s13 = scalar_lea.vmem [#allocation8], %s660_s15 }
  0x6b   : > { %986 = vsyncadd (%p1307_p8), [#allocation6], 4294959104  ;;  %378 = vmatprep.mubr.f32.mxu0 %v1014_v0  ;;  %v704_v4 = vpack.c.bf16 %v273_v2, %v271_v1  ;;  %v272_v5 = vld [vmem:[#allocation5 + $0x10] sm:$0xff]  ;;  %v275_v6 = vld [vmem:[#allocation5 + $0x28] sm:$0xff]  ;;  %s563_s7 = sshll.u32 %s268_s13, 4  ;;  %s1245_s8 = scalar_lea.hbm %s1294_s5, %s666_s12  ;;  %s1247_s7 = int_to_ptr.vmem [resolvable:$true] %s563_s7 }
  0x6c   : > { %v277_v7 = vld [vmem:[#allocation5 + $0x38] sm:$0xff]  ;;  %v706_v8 = vpack.c.bf16 %v272_v5, %v270_v3  ;;  %v274_v10 = vld [vmem:[#allocation5 + $0x20] sm:$0xff]  ;;  %v276_v11 = vld [vmem:[#allocation5 + $0x30] sm:$0xff]  ;;  %s550_s9 = scalar_lea.sflag [#allocation4], %s1216_s14  ;;  %s935_s11 = scalar_lea.vmem %s1247_s7, 128 }
  0x6d   : > { %v708_v9 = vpack.c.bf16 %v277_v7, %v275_v6  ;;  %v279_v12 = vld [vmem:[#allocation5 + $0x48] sm:$0xff]  ;;  %705 = vmatprep.subr.bf16.mxu0 %v704_v4  ;;  %v281_v13 = vld [vmem:[#allocation5 + $0x58] sm:$0xff]  ;;  %v710_v14 = vpack.c.bf16 %v276_v11, %v274_v10  ;;  %v278_v16 = vld [vmem:[#allocation5 + $0x40] sm:$0xff]  ;;  %p936_p11 = scmp.ne.s32.totalorder %s1247_s7, %s935_s11  ;;  %p1308_p0 = scmp.ne.s32.totalorder %s1303_s30, 0 }
  0x6e   : > { %707 = vmatpush1.bf16.msra.mxu0 %v706_v8  ;;  %v712_v15 = vpack.c.bf16 %v281_v13, %v279_v12  ;;  %v280_v17 = vld [vmem:[#allocation5 + $0x50] sm:$0xff]  ;;  %v283_v18 = vld [vmem:[#allocation5 + $0x68] sm:$0xff]  ;;  %v285_v19 = vld [vmem:[#allocation5 + $0x78] sm:$0xff]  ;;  %s1016_s22 = smov [#allocation8]  }
  0x6f   : > { %709 = vmatprep.subr.bf16.mxu0 %v708_v9  ;;  %v714_v20 = vpack.c.bf16 %v280_v17, %v278_v16  ;;  %v716_v21 = vpack.c.bf16 %v285_v19, %v283_v18  ;;  %v282_v22 = vld [vmem:[#allocation5 + $0x60] sm:$0xff]  ;;  %v284_v23 = vld [vmem:[#allocation5 + $0x70] sm:$0xff]  ;;  %v287_v24 = vld [vmem:[#allocation5 + $0x88] sm:$0xff]  ;;  %p937_p1 = pnand %p936_p11, %p1308_p0  ;;  %s939_s15 = sshll.u32 %s1016_s22, 4  ;;  %s940_s15 = int_to_ptr.vmem [resolvable:$false] %s939_s15 }
  0x70   : > { %v289_v25 = vld [vmem:[#allocation5 + $0x98] sm:$0xff]  ;;  %v718_v26 = vpack.c.bf16 %v284_v23, %v282_v22  ;;  %v286_v28 = vld [vmem:[#allocation5 + $0x80] sm:$0xff]  ;;  %v288_v29 = vld [vmem:[#allocation5 + $0x90] sm:$0xff]  ;;  %s941_s17 = scalar_lea.vmem %s940_s15, 256  ;;  %p942_p5 = scmp.lt.s32.totalorder %s1247_s7, %s940_s15 }
  0x71   : > { %v720_v27 = vpack.c.bf16 %v289_v25, %v287_v24  ;;  %v291_v30 = vld [vmem:[#allocation5 + $0xa8] sm:$0xff]  ;;  %v293_v31 = vld [vmem:[#allocation5 + $0xb8] sm:$0xff]  ;;  %v722_v32 = vpack.c.bf16 %v288_v29, %v286_v28  ;;  %v290_v34 = vld [vmem:[#allocation5 + $0xa0] sm:$0xff]  ;;  %p938_p3 = pneg %p937_p1  ;;  %p943_p9 = scmp.lt.s32.totalorder %s941_s17, %s935_s11 }
  0x72   : > { %711 = vmatpush1.bf16.msra.mxu0 %v710_v14  ;;  %v724_v33 = vpack.c.bf16 %v293_v31, %v291_v30  ;;  %v292_v35 = vld [vmem:[#allocation5 + $0xb0] sm:$0xff]  ;;  %v295_v36 = vld [vmem:[#allocation5 + $0xc8] sm:$0xff]  ;;  %v297_v37 = vld [vmem:[#allocation5 + $0xd8] sm:$0xff] }
  0x73   : > { %713 = vmatprep.subr.bf16.mxu0 %v712_v15  ;;  %v726_v38 = vpack.c.bf16 %v292_v35, %v290_v34  ;;  %v728_v39 = vpack.c.bf16 %v297_v37, %v295_v36  ;;  %v294_v40 = vld [vmem:[#allocation5 + $0xc0] sm:$0xff]  ;;  %v296_v41 = vld [vmem:[#allocation5 + $0xd0] sm:$0xff]  ;;  %v299_v42 = vld [vmem:[#allocation5 + $0xe8] sm:$0xff]  ;;  %v304_v34 = vlaneseq  ;;  %p944_p12 = por %p943_p9, %p942_p5 }
  0x74   : > { %v301_v43 = vld [vmem:[#allocation5 + $0xf8] sm:$0xff]  ;;  %v730_v44 = vpack.c.bf16 %v296_v41, %v294_v40  ;;  %v298_v46 = vld [vmem:[#allocation5 + $0xe0] sm:$0xff]  ;;  %v300_v47 = vld [vmem:[#allocation5 + $0xf0] sm:$0xff] }
  0x75   : > { %v732_v45 = vpack.c.bf16 %v301_v43, %v299_v42  ;;  %v734_v48 = vpack.c.bf16 %v300_v47, %v298_v46  ;;  %v269_v49 = vld [vmem:[%s1222_s23] sm:$0xff]  ;;  %v455_v50 = vld [vmem:[#allocation7 + $0x80] sm:$0xff]  ;;  %v456_v51 = vld [vmem:[#allocation7 + $0x88] sm:$0xff]  ;;  %v305_v35 = vshrl.u32 %v304_v34, 7  ;;  %p945_p2 = pnand %p944_p12, %p938_p3 }
  0x76   : > { %715 = vmatpush1.bf16.msra.mxu0 %v714_v20  ;;  %v439_v52 = vld [vmem:[#allocation7] sm:$0xff]  ;;  %v736_v53 = vpack.c.bf16 %v456_v51, %v455_v50  ;;  %v440_v54 = vld [vmem:[#allocation7 + $0x8] sm:$0xff]  ;;  %v457_v55 = vld [vmem:[#allocation7 + $0x90] sm:$0xff] }
  0x77   : > { %717 = vmatprep.subr.bf16.mxu0 %v716_v21  ;;  %v458_v56 = vld [vmem:[#allocation7 + $0x98] sm:$0xff]  ;;  %v738_v57 = vpack.c.bf16 %v440_v54, %v439_v52  ;;  %v441_v59 = vld [vmem:[#allocation7 + $0x10] sm:$0xff]  ;;  %v459_v61 = vld [vmem:[#allocation7 + $0xa0] sm:$0xff]  ;;  %v306_v36 = vsub.s32 0, %v305_v35 }
  0x78   : > { %v740_v58 = vpack.c.bf16 %v458_v56, %v457_v55  ;;  %v442_v60 = vld [vmem:[#allocation7 + $0x18] sm:$0xff]  ;;  %737 = vmatprep.subr.bf16.mxu1 %v736_v53  ;;  %v460_v62 = vld [vmem:[#allocation7 + $0xa8] sm:$0xff]  ;;  %v443_v1 = vld [vmem:[#allocation7 + $0x20] sm:$0xff] }
  0x79   : > { %739 = vmatpush3.bf16.msra.mxu1 %v738_v57  ;;  %v742_v63 = vpack.c.bf16 %v442_v60, %v441_v59  ;;  %v744_v0 = vpack.c.bf16 %v460_v62, %v459_v61  ;;  %v444_v2 = vld [vmem:[#allocation7 + $0x28] sm:$0xff]  ;;  %v461_v3 = vld [vmem:[#allocation7 + $0xb0] sm:$0xff]  ;;  %v462_v4 = vld [vmem:[#allocation7 + $0xb8] sm:$0xff] }
  0x7a   : > { %719 = vmatpush1.bf16.msra.mxu0 %v718_v26  ;;  %741 = vmatprep.subr.bf16.mxu1 %v740_v58  ;;  %v746_v5 = vpack.c.bf16 %v444_v2, %v443_v1  ;;  %v748_v6 = vpack.c.bf16 %v462_v4, %v461_v3  ;;  %v445_v7 = vld [vmem:[#allocation7 + $0x30] sm:$0xff]  ;;  %v446_v8 = vld [vmem:[#allocation7 + $0x38] sm:$0xff]  ;;  %v463_v9 = vld [vmem:[#allocation7 + $0xc0] sm:$0xff] }
  0x7b   : > { %721 = vmatprep.subr.bf16.mxu0 %v720_v27  ;;  %v464_v10 = vld [vmem:[#allocation7 + $0xc8] sm:$0xff]  ;;  %v750_v11 = vpack.c.bf16 %v446_v8, %v445_v7  ;;  %v447_v13 = vld [vmem:[#allocation7 + $0x40] sm:$0xff]  ;;  %v465_v15 = vld [vmem:[#allocation7 + $0xd0] sm:$0xff] }
  0x7c   : > { %v752_v12 = vpack.c.bf16 %v464_v10, %v463_v9  ;;  %v448_v14 = vld [vmem:[#allocation7 + $0x48] sm:$0xff]  ;;  %v466_v16 = vld [vmem:[#allocation7 + $0xd8] sm:$0xff]  ;;  %v449_v19 = vld [vmem:[#allocation7 + $0x50] sm:$0xff] }
  0x7d   : > { %743 = vmatpush3.bf16.msra.mxu1 %v742_v63  ;;  %v754_v17 = vpack.c.bf16 %v448_v14, %v447_v13  ;;  %v756_v18 = vpack.c.bf16 %v466_v16, %v465_v15  ;;  %v450_v20 = vld [vmem:[#allocation7 + $0x58] sm:$0xff]  ;;  %v467_v21 = vld [vmem:[#allocation7 + $0xe0] sm:$0xff]  ;;  %v468_v22 = vld [vmem:[#allocation7 + $0xe8] sm:$0xff] }
  0x7e   : > { %723 = vmatpush1.bf16.msra.mxu0 %v722_v32  ;;  %745 = vmatprep.subr.bf16.mxu1 %v744_v0  ;;  %v758_v23 = vpack.c.bf16 %v450_v20, %v449_v19  ;;  %v760_v24 = vpack.c.bf16 %v468_v22, %v467_v21  ;;  %v451_v25 = vld [vmem:[#allocation7 + $0x60] sm:$0xff]  ;;  %v452_v26 = vld [vmem:[#allocation7 + $0x68] sm:$0xff]  ;;  %v469_v27 = vld [vmem:[#allocation7 + $0xf0] sm:$0xff]  ;;  %v1015_v20 = vmov -1.0  }
  0x7f   : > { %725 = vmatprep.subr.bf16.mxu0 %v724_v33  ;;  %v470_v28 = vld [vmem:[#allocation7 + $0xf8] sm:$0xff]  ;;  %v762_v29 = vpack.c.bf16 %v452_v26, %v451_v25  ;;  %v453_v31 = vld [vmem:[#allocation7 + $0x70] sm:$0xff] }
  0x80   : > { %v764_v30 = vpack.c.bf16 %v470_v28, %v469_v27  ;;  %v454_v32 = vld [vmem:[#allocation7 + $0x78] sm:$0xff]  ;;  %v302_v37 = vld [vmem:[%s1291_s2] sm:$0x3] }
  0x81   : > { %747 = vmatpush3.bf16.msra.mxu1 %v746_v5  ;;  %v766_v33 = vpack.c.bf16 %v454_v32, %v453_v31 }
  0x82   : > { %727 = vmatpush1.bf16.msra.mxu0 %v726_v38  ;;  %749 = vmatprep.subr.bf16.mxu1 %v748_v6  ;;  %v310_v38 = vsub.s32 1, %v305_v35 }
  0x83   : > { %729 = vmatprep.subr.bf16.mxu0 %v728_v39  ;;  %v307_v39 = vrot.slane %v302_v37, %v306_v36 }
  0x84   : > { %v311_v40 = vrot.slane %v302_v37, %v310_v38 }
  0x85   : > { %751 = vmatpush3.bf16.msra.mxu1 %v750_v11 }
  0x86   : > { %731 = vmatpush1.bf16.msra.mxu0 %v730_v44  ;;  %753 = vmatprep.subr.bf16.mxu1 %v752_v12 }
  0x87   : > { %733 = vmatprep.subr.bf16.mxu0 %v732_v45 }
  0x89   : > { %755 = vmatpush3.bf16.msra.mxu1 %v754_v17 }
  0x8a   : > { %735 = vmatpush1.bf16.msra.mxu0 %v734_v48  ;;  %757 = vmatprep.subr.bf16.mxu1 %v756_v18 }
  0x8d   : > { %379 = vmatmul.mubr.f32.vlgmr.msra.gmra.mrb[0].mxu0 %v269_v49  ;;  %759 = vmatpush3.bf16.msra.mxu1 %v758_v23 }
  0x8e   : > { %761 = vmatprep.subr.bf16.mxu1 %v760_v24 }
  0x91   : > { %763 = vmatpush3.bf16.msra.mxu1 %v762_v29 }
  0x92   : > { %765 = vmatprep.subr.bf16.mxu1 %v764_v30 }
  0x95   : > { %767 = vmatpush3.bf16.msra.mxu1 %v766_v33  ;;  %v664_v33 = vld [vmem:[%s1293_s4] ss:$0 sm:$0xff] }
 0x160   : > { %v380_v41 = vpop.f32.mrb[0].mxu0 }
 0x161   : > { %v381_v42 = vadd.f32 %v380_v41, %v307_v39  ;;  %v382_v43 = vpop.f32.mrb[1].mxu0 }
 0x162   : > { %v383_v44 = vadd.f32 %v382_v43, %v311_v40 }
 0x163   : > { %v387_v45 = vmul.f32 0.70710677, %v381_v42  ;;  %v385_v29 = vmul.f32 0.5, %v381_v42 }
 0x164   : > { %v388_v46 = vmul.f32 0.70710677, %v383_v44  ;;  %v386_v27 = vmul.f32 0.5, %v383_v44 }
 0x165   : > { %v393_v47 = vand.u32 2147483647, %v387_v45  ;;  %vm389_vm0 = vcmp.ge.f32.partialorder %v387_v45, 0.0 }
 0x166   : > { %v394_v48 = vand.u32 2147483647, %v388_v46  ;;  %vm390_vm1 = vcmp.ge.f32.partialorder %v388_v46, 0.0  ;;  %v391_v21 = vsel %vm389_vm0, 1.0, %v1015_v20 }
 0x167   : > { %v395_v49 = vmul.f32 0.3275911, %v393_v47  ;;  %v421_v53 = vsub.f32 0.0, %v393_v47  ;;  %v392_v23 = vsel %vm390_vm1, 1.0, %v1015_v20 }
 0x168   : > { %v396_v50 = vmul.f32 0.3275911, %v394_v48  ;;  %v422_v54 = vsub.f32 0.0, %v394_v48 }
 0x169   : > { %v397_v51 = vadd.f32 1.0, %v395_v49  ;;  %v423_v56 = vmul.f32 %v421_v53, %v393_v47 }
 0x16a   : > { %v398_v52 = vadd.f32 1.0, %v396_v50  ;;  %v424_v58 = vmul.f32 %v422_v54, %v394_v48 }
 0x16b   : > { %841 = vrcp.f32 %v397_v51  ;;  %v425_v62 = vmul.f32 1.442695, %v423_v56 }
 0x16c   : > { %843 = vrcp.f32 %v398_v52  ;;  %v427_v0 = vmul.f32 1.442695, %v424_v58 }
 0x16d   : > { %845 = vpow2.f32 %v425_v62 }
 0x16e   : > { %847 = vpow2.f32 %v427_v0 }
 0x175   : > { %v842_v55 = vpop.eup %841 }
 0x176   : > { %v844_v57 = vpop.eup %843  ;;  %v403_v59 = vmul.f32 1.0614054, %v842_v55 }
 0x177   : > { %v404_v60 = vmul.f32 1.0614054, %v844_v57  ;;  %v846_v14 = vpop.eup %845 }
 0x178   : > { %v405_v61 = vadd.f32 -1.4531521, %v403_v59  ;;  %v848_v16 = vpop.eup %847 }
 0x179   : > { %v406_v63 = vadd.f32 -1.4531521, %v404_v60 }
 0x17a   : > { %v407_v1 = vmul.f32 %v842_v55, %v405_v61 }
 0x17b   : > { %v408_v2 = vmul.f32 %v844_v57, %v406_v63 }
 0x17c   : > { %v409_v3 = vadd.f32 1.4214138, %v407_v1 }
 0x17d   : > { %v410_v4 = vadd.f32 1.4214138, %v408_v2 }
 0x17e   : > { %v411_v5 = vmul.f32 %v842_v55, %v409_v3 }
 0x17f   : > { %v412_v6 = vmul.f32 %v844_v57, %v410_v4 }
 0x180   : > { %v413_v7 = vadd.f32 -0.28449672, %v411_v5 }
 0x181   : > { %v414_v8 = vadd.f32 -0.28449672, %v412_v6 }
 0x182   : > { %v415_v9 = vmul.f32 %v842_v55, %v413_v7 }
 0x183   : > { %v416_v10 = vmul.f32 %v844_v57, %v414_v8 }
 0x184   : > { %v417_v11 = vadd.f32 0.2548296, %v415_v9 }
 0x185   : > { %v418_v12 = vadd.f32 0.2548296, %v416_v10 }
 0x186   : > { %v419_v13 = vmul.f32 %v842_v55, %v417_v11 }
 0x187   : > { %v420_v15 = vmul.f32 %v844_v57, %v418_v12 }
 0x188   : > { %v429_v17 = vmul.f32 %v846_v14, %v419_v13 }
 0x189   : > { %v430_v18 = vmul.f32 %v848_v16, %v420_v15 }
 0x18a   : > { %v431_v19 = vsub.f32 1.0, %v429_v17 }
 0x18b   : > { %v432_v22 = vsub.f32 1.0, %v430_v18 }
 0x18c   : > { %v433_v24 = vmul.f32 %v431_v19, %v391_v21 }
 0x18d   : > { %v434_v25 = vmul.f32 %v432_v22, %v392_v23 }
 0x18e   : > { %v435_v26 = vadd.f32 1.0, %v433_v24 }
 0x18f   : > { %v436_v28 = vadd.f32 1.0, %v434_v25 }
 0x190   : > { %v437_v31 = vmul.f32 %v435_v26, %v385_v29 }
 0x191   : > { %v438_v30 = vmul.f32 %v436_v28, %v386_v27 }
 0x193   : > { %542 = vmatprep.mubr.f32.mxu1 %v438_v30 }
 0x194   : > { %543 = vmatmul.mubr.f32.vlgmr.msra.gmra.mrb[0].mxu1 %v437_v31 }
 0x267   : > { %v701_v32 = vpop.f32.mrb[0].mxu1 }
 0x268   : > { %v702_v34 = vpop.f32.mrb[1].mxu1 }
 0x269   : > { %v703_v35 = vadd.f32 %v702_v34, %v701_v32 }
 0x26b   : > { %v545_v36 = vadd.f32 %v703_v35, %v664_v33 }
 0x26d   : > { %548 = vst [vmem:[%s268_s13] sm:$0xff] %v545_v36 }
 0x26e   : > { %948 = shalt.err (!%p945_p2)
}
 0x26f   : > { %s949_s14 = scalar_lea.hbm %s1245_s8, 128  ;;  %s953_s26 = scalar_lea.hbm %s1294_s5, 256 }
 0x270   : > { %p950_p13 = scmp.ne.s32.totalorder %s1245_s8, %s949_s14  ;;  %p954_p4 = scmp.lt.u32.totalorder %s1245_s8, %s1294_s5 }
 0x271   : > { %p955_p7 = scmp.lt.u32.totalorder %s953_s26, %s949_s14  ;;  %p957_p11 = scmp.lt.u32.totalorder %s949_s14, %s1245_s8 }
 0x272   : > { %p951_p6 = pnand %p950_p13, %p1308_p0 }
 0x273   : > { %p956_p8 = por %p955_p7, %p954_p4 }
 0x274   : > { %p952_p10 = pneg %p951_p6 }
 0x275   : > { %p958_p1 = por %p957_p11, %p956_p8 }
 0x277   : > { %p959_p3 = pnand %p958_p1, %p952_p10 }
 0x279   : > { %962 = shalt.err (!%p959_p3)
}
 0x27a   : > { %778 = dma.vmem_to_hbm [thread:$0]  (%p1308_p0), %s1247_s7, 128, %s1245_s8, %s550_s9  }
 0x27b PF: > { %s575_s12 = sand.u32 1, %s993_s18   ;;  %p1309_p5 = scmp.ne.s32.totalorder %s1299_s25, 0 }
 0x27c   : > { %p1310_p9 = scmp.ge.s32.totalorder %s1005_s21, 2  ;;  %s576_s13 = scalar_lea.sflag [#allocation4], %s575_s12 }
 0x27e   : > { %p792_p12 = pnand %p1310_p9, %p1309_p5 }
 0x280   : > { %988 = dma.done.wait (!%p792_p12), %s576_s13, 128  }
 0x281   : > { %990 = vsyncadd (!%p792_p12), %s576_s13, 4294967168  ;;  %p19_p2 = scmp.ge.s32.totalorder %s1157_s16, 4   ;;  %s1311_s18 = smov %s997_s19 }
 0x282   : > { %s1312_s19 = smov %s1001_s20  ;;  %s1313_s20 = smov %s1166_s27 }
 0x283   : > { %s1314_s21 = smov %s1157_s16  ;;  %21 = sbr.rel (!%p19_p2) target bundleno = 6 (0x6), region = 93 }
 0x28a   :  { %581 = vsyncpa [#allocation3], 1 }
 0x28b   :  { %583 = vsyncpa [#allocation3 + $0x1], 1 }
 0x28c   :  { %584 = vsyncpa [#allocation6], 1 }
 0x28d   :  { %585 = vsyncpa [#allocation4], 1 }
 0x28e   :  { %587 = vsyncpa [#allocation4 + $0x1], 1 }

</bundles_post_ra>
